<compile_context>
chip_gen: v7x
topology: tpu7x:2x2x1
jax: 0.10.0
libtpu: 0.0.40
codegen_flags: <defaults>
</compile_context>

<pallas_src>
import numpy as np
import jax
import jax.numpy as jnp
from jax.experimental import pallas as pl
from jax.experimental.pallas import tpu as pltpu

EPS_BN = 1e-5
EPS_LN = 1e-5


# ----------------------------- helpers -----------------------------

def positional_encoding(n_pos, d_model):
    position = np.arange(n_pos, dtype=np.float32)[:, None]
    div_term = np.exp(np.arange(0, d_model, 2, dtype=np.float32)
                      * (-np.log(10000.0) / d_model))
    pe = np.zeros((n_pos, d_model), dtype=np.float32)
    pe[:, 0::2] = np.sin(position * div_term)
    pe[:, 1::2] = np.cos(position * div_term)
    return jnp.asarray(pe)


def _make_vec_layout(OC1, OC2, d_model, dff, n_classes):
    # One lane-concatenated f32 operand holding every small vector.
    # bf1 (dff) goes first so its slice starts 128-lane aligned.
    names_lens = (('bf1', dff), ('sh1', OC1), ('sh2', OC2), ('blin', d_model),
                  ('bqkv', 3 * d_model), ('bo', d_model), ('ln1g', d_model),
                  ('ln1b', d_model), ('bf2', d_model), ('ln2g', d_model),
                  ('ln2b', d_model), ('bcls', n_classes))
    layout, off = {}, 0
    for name, ln in names_lens:
        layout[name] = (off, ln)
        off += ln
    return layout, off


# ----------------------------- fused Pallas kernel -----------------------------

def _make_fused_kernel(B, T, C, OC1, OC2, d_model, nhead, dff, n_classes,
                       vec_layout):
    S = B                                   # seq length after the PE broadcast quirk
    Tq = T // 4
    F = OC2 * Tq
    hd = d_model // nhead
    inv_sqrt_hd = 1.0 / float(np.sqrt(hd))
    f32 = jnp.float32

    def _layer_norm(z, g, b):
        mu = jnp.mean(z, axis=-1, keepdims=True)
        var = jnp.mean((z - mu) ** 2, axis=-1, keepdims=True)
        return (z - mu) * jax.lax.rsqrt(var + EPS_LN) * g + b

    def kernel(x_ref, w1_ref, w2_ref, wlinpe_ref, wattn_ref, vec_ref,
               wf1_hbm, wf2_hbm, out_ref, wf1_buf, wf2_buf, dma_sem):

        def vec(name):
            off, ln = vec_layout[name]
            return vec_ref[:, off:off + ln]

        # Kick off the only non-trivial HBM transfer (bf16 FFN weights, 128 KiB)
        # immediately so it overlaps with the conv + attention prologue below.
        cp_wf1 = pltpu.make_async_copy(wf1_hbm, wf1_buf, dma_sem.at[0])
        cp_wf2 = pltpu.make_async_copy(wf2_hbm, wf2_buf, dma_sem.at[1])
        cp_wf1.start()
        cp_wf2.start()

        # Rows are time-major (row = t*B + b): the first/last `nrows` rows are
        # exactly the sequence boundary, so a zero block implements the conv's
        # zero padding with no iota masks.
        def _shift_blocks(v, nrows):
            rows, cols = v.shape
            zblk = jnp.zeros((nrows, cols), f32)
            prev = jnp.concatenate([zblk, v[0:rows - nrows, :]], axis=0)
            nxt = jnp.concatenate([v[nrows:rows, :], zblk], axis=0)
            return prev, nxt

        # Deferred MaxPool(1,2): out[r] = max(v[r], v[r + nrows]); the rows at
        # odd (pooled) times become dead and are simply never read downstream.
        def _pair_max(v, nrows):
            rows, cols = v.shape
            shifted = jnp.concatenate(
                [v[nrows:rows, :], jnp.zeros((nrows, cols), f32)], axis=0)
            return jnp.maximum(v, shifted)

        # ---- conv block 1: Conv1d(k=3,pad=1) + folded BN + ReLU (pool deferred) ----
        x = x_ref[...]                                     # (T*B, C), time-major
        xp, xn = _shift_blocks(x, B)                       # t-1 / t+1
        col1 = jnp.concatenate([xp, x, xn], axis=1)        # in-kernel im2col
        h1 = jnp.maximum(
            jnp.dot(col1, w1_ref[...], preferred_element_type=f32) + vec('sh1'),
            0.0)
        m1 = _pair_max(h1, B)                              # valid at even t

        # ---- conv block 2 (runs on all rows; odd-t rows are dead weight) ----
        hp, hn = _shift_blocks(m1, 2 * B)                  # level-2 t' -/+ 1
        col2 = jnp.concatenate([hp, m1, hn], axis=1)
        h2 = jnp.maximum(
            jnp.dot(col2, w2_ref[...], preferred_element_type=f32) + vec('sh2'),
            0.0)
        m2 = _pair_max(h2, 2 * B)                          # valid at t % 4 == 0

        # ---- flatten: lane-concat of the Tq valid (contiguous) row blocks ----
        flat = jnp.concatenate(
            [m2[4 * u * B:4 * u * B + B, :] for u in range(Tq)], axis=1)  # (B, F)

        # ---- Linear to d_model (once) + the (B, B, d) positional-encoding quirk ----
        wlin = wlinpe_ref[0:F, :]
        pe_exp = wlinpe_ref[F:F + B * S, :]                # pe[i] repeated S times
        sp = jnp.dot(flat, wlin, preferred_element_type=f32) + vec('blin')
        xseq = jnp.concatenate([sp] * B, axis=0) + pe_exp  # (B*S, d)

        # ---- transformer encoder layer (post-norm, ReLU FFN, eval mode) ----
        wqkv = wattn_ref[:, 0:3 * d_model]
        wo = wattn_ref[:, 3 * d_model:4 * d_model]
        wcls = wattn_ref[:, 4 * d_model:4 * d_model + n_classes]

        qkv = jnp.dot(xseq, wqkv, preferred_element_type=f32) + vec('bqkv')
        q = qkv[:, 0:d_model]
        k = qkv[:, d_model:2 * d_model]
        v = qkv[:, 2 * d_model:3 * d_model]
        ctx_rows = []
        for i in range(B):                                 # static tiny loops
            r0 = i * S
            heads = []
            for h in range(nhead):
                c0 = h * hd
                qh = q[r0:r0 + S, c0:c0 + hd]
                kh = k[r0:r0 + S, c0:c0 + hd]
                vh = v[r0:r0 + S, c0:c0 + hd]
                sc = jax.lax.dot_general(qh, kh, (((1,), (1,)), ((), ())),
                                         preferred_element_type=f32) * inv_sqrt_hd
                sc = sc - jnp.max(sc, axis=-1, keepdims=True)
                p = jnp.exp(sc)
                p = p / jnp.sum(p, axis=-1, keepdims=True)
                heads.append(jnp.dot(p, vh, preferred_element_type=f32))
            ctx_rows.append(jnp.concatenate(heads, axis=1))
        ctx = jnp.concatenate(ctx_rows, axis=0)            # (B*S, d)
        attn = jnp.dot(ctx, wo, preferred_element_type=f32) + vec('bo')

        y = _layer_norm(xseq + attn, vec('ln1g'), vec('ln1b'))   # Residual + LN

        # ---- FFN: bf16 weights only for HBM traffic; math stays f32 ----
        cp_wf1.wait()
        cp_wf2.wait()
        wf1 = wf1_buf[...].astype(f32)
        wf2 = wf2_buf[...].astype(f32)
        hid = jnp.maximum(
            jnp.dot(y, wf1, preferred_element_type=f32) + vec('bf1'), 0.0)
        ffn = jnp.dot(hid, wf2, preferred_element_type=f32) + vec('bf2')

        z = _layer_norm(y + ffn, vec('ln2g'), vec('ln2b'))       # Residual + LN

        # ---- classifier + LogSoftmax for every row; wrapper keeps last-of-seq ----
        logits = jnp.dot(z, wcls, preferred_element_type=f32) + vec('bcls')
        mx = jnp.max(logits, axis=-1, keepdims=True)
        lse = jnp.log(jnp.sum(jnp.exp(logits - mx), axis=-1, keepdims=True)) + mx
        out_ref[...] = logits - lse

    return kernel


# ----------------------------- wrapper -----------------------------

def hybrid_forward_pallas(x, P, d_model=16, nhead=2):
    B, C, T = x.shape
    assert T % 4 == 0, "temporal length must be divisible by 4 (two MaxPool(1,2))"
    Tq = T // 4
    OC1 = P['conv1_w'].shape[0]
    OC2 = P['conv2_w'].shape[0]
    dff = P['ffn1_w'].shape[0]
    n_classes = P['cls_w'].shape[0]
    F = OC2 * Tq
    S = B
    f32 = jnp.float32

    # (B, C, T) -> time-major rows (T*B, C): row = t*B + b.
    x2d = x.transpose(2, 0, 1).reshape(T * B, C)

    # Conv weights as (3*Cin, OC) matmul operands (kernel-tap-major rows) with
    # the eval-mode BatchNorm scale folded into the columns.
    s1 = P['bn1_g'] / jnp.sqrt(P['bn1_rv'] + EPS_BN)
    w1 = P['conv1_w'].transpose(2, 1, 0).reshape(3 * C, OC1) * s1[None, :]
    sh1 = (P['conv1_b'] - P['bn1_rm']) * s1 + P['bn1_b']
    s2 = P['bn2_g'] / jnp.sqrt(P['bn2_rv'] + EPS_BN)
    w2 = P['conv2_w'].transpose(2, 1, 0).reshape(3 * OC1, OC2) * s2[None, :]
    sh2 = (P['conv2_b'] - P['bn2_rm']) * s2 + P['bn2_b']

    # Linear weight permuted from (c*Tq + t) to the kernel's (t*OC2 + c) column
    # order, with the repeated positional-encoding rows appended (one DMA).
    wlin = P['lin_w'].reshape(d_model, OC2, Tq).transpose(2, 1, 0).reshape(F, d_model)
    pe_exp = jnp.repeat(positional_encoding(B, d_model), S, axis=0)      # (B*S, d)
    wlinpe = jnp.concatenate([wlin, pe_exp], axis=0)                     # (F+B*S, d)

    # QKV + output projection + classifier packed on lanes (one operand).
    wqkv = jnp.concatenate([P['wq'], P['wk'], P['wv']], axis=0).T        # (d, 3d)
    wattn = jnp.concatenate([wqkv, P['wo'].T, P['cls_w'].T], axis=1)     # (d, 4d+nc)

    # All small bias / LN vectors packed into one lane-concatenated f32 operand.
    vec_layout, vec_len = _make_vec_layout(OC1, OC2, d_model, dff, n_classes)
    pieces = {
        'bf1': P['ffn1_b'], 'sh1': sh1, 'sh2': sh2, 'blin': P['lin_b'],
        'bqkv': jnp.concatenate([P['bq'], P['bk'], P['bv']]), 'bo': P['bo'],
        'ln1g': P['ln1_g'], 'ln1b': P['ln1_b'], 'bf2': P['ffn2_b'],
        'ln2g': P['ln2_g'], 'ln2b': P['ln2_b'], 'bcls': P['cls_b'],
    }
    vec = jnp.concatenate([pieces[name].reshape(-1).astype(f32)
                           for name in vec_layout], axis=0).reshape(1, vec_len)

    # bf16 FFN weights (the only non-trivial HBM traffic), DMA'd manually inside
    # the kernel and upcast to f32 there.
    wf1 = P['ffn1_w'].T.astype(jnp.bfloat16)                             # (d, dff)
    wf2 = P['ffn2_w'].T.astype(jnp.bfloat16)                             # (dff, d)

    kernel = _make_fused_kernel(B, T, C, OC1, OC2, d_model, nhead, dff,
                                n_classes, vec_layout)

    vmem_ops = (x2d, w1, w2, wlinpe, wattn, vec)
    in_specs = ([pl.BlockSpec(a.shape, lambda i: (0, 0)) for a in vmem_ops]
                + [pl.BlockSpec(memory_space=pl.ANY),
                   pl.BlockSpec(memory_space=pl.ANY)])

    out_full = pl.pallas_call(
        kernel,
        out_shape=jax.ShapeDtypeStruct((B * S, n_classes), f32),
        grid=(1,),
        in_specs=in_specs,
        out_specs=pl.BlockSpec((B * S, n_classes), lambda i: (0, 0)),
        scratch_shapes=[pltpu.VMEM((d_model, dff), jnp.bfloat16),
                        pltpu.VMEM((dff, d_model), jnp.bfloat16),
                        pltpu.SemaphoreType.DMA((2,))],
        compiler_params=pltpu.CompilerParams(
            dimension_semantics=("arbitrary",)),
    )(*vmem_ops, wf1, wf2)

    # Take the last element of every length-S sequence -> (B, n_classes).
    return out_full.reshape(B, S, n_classes)[:, -1, :]


# ----------------------------- pure-JAX reference -----------------------------

def _layer_norm_ref(x, g, b):
    mu = jnp.mean(x, axis=-1, keepdims=True)
    var = jnp.mean((x - mu) ** 2, axis=-1, keepdims=True)
    return (x - mu) / jnp.sqrt(var + EPS_LN) * g + b


def hybrid_forward_reference(x, P, d_model=16, nhead=2):
    B, C, T = x.shape
    hd = d_model // nhead

    def conv_bn_pool(inp, w, b, g, bb, rm, rv):
        Bt, Ct, Tt = inp.shape
        xp = jnp.pad(inp, ((0, 0), (0, 0), (1, 1)))
        pat = jnp.stack([xp[:, :, k:k + Tt] for k in range(3)], axis=-1)  # (B,C,T,3)
        h = jnp.einsum('bctk,ock->bot', pat, w) + b[None, :, None]
        h = ((h - rm[None, :, None]) / jnp.sqrt(rv[None, :, None] + EPS_BN)
             * g[None, :, None] + bb[None, :, None])
        h = jnp.maximum(h, 0.0)
        return jnp.max(h.reshape(Bt, w.shape[0], Tt // 2, 2), axis=-1)

    h = conv_bn_pool(x, P['conv1_w'], P['conv1_b'], P['bn1_g'], P['bn1_b'],
                     P['bn1_rm'], P['bn1_rv'])
    h = conv_bn_pool(h, P['conv2_w'], P['conv2_b'], P['bn2_g'], P['bn2_b'],
                     P['bn2_rm'], P['bn2_rv'])
    flat = h.reshape(B, -1)
    sp = flat @ P['lin_w'].T + P['lin_b']
    pe = positional_encoding(B, d_model)
    x3 = sp[None, :, :] + pe[:, None, :]

    def enc_layer(xx):
        S = xx.shape[0]
        q = xx @ P['wq'].T + P['bq']
        k = xx @ P['wk'].T + P['bk']
        v = xx @ P['wv'].T + P['bv']
        qh = q.reshape(S, nhead, hd).transpose(1, 0, 2)
        kh = k.reshape(S, nhead, hd).transpose(1, 0, 2)
        vh = v.reshape(S, nhead, hd).transpose(1, 0, 2)
        sc = jnp.einsum('hqd,hkd->hqk', qh, kh) / np.sqrt(hd)
        p = jax.nn.softmax(sc, axis=-1)
        ctx = jnp.einsum('hqk,hkd->hqd', p, vh).transpose(1, 0, 2).reshape(S, d_model)
        a = ctx @ P['wo'].T + P['bo']
        y = _layer_norm_ref(xx + a, P['ln1_g'], P['ln1_b'])
        f = jnp.maximum(y @ P['ffn1_w'].T + P['ffn1_b'], 0.0) @ P['ffn2_w'].T + P['ffn2_b']
        return _layer_norm_ref(y + f, P['ln2_g'], P['ln2_b'])

    out = jax.vmap(enc_layer)(x3)
    last = out[:, -1, :]
    logits = last @ P['cls_w'].T + P['cls_b']
    return jax.nn.log_softmax(logits, axis=-1)


# ----------------------------- params / main -----------------------------

def init_params(key, n_classes, input_shape, d_model=16, dff=2048):
    C, T = input_shape
    ks = jax.random.split(key, 20)
    s = 0.05
    f32 = jnp.float32
    P = {
        'conv1_w': jax.random.normal(ks[0], (16, C, 3), f32) * s,
        'conv1_b': jax.random.normal(ks[1], (16,), f32) * s,
        'bn1_g': jnp.ones((16,), f32), 'bn1_b': jnp.zeros((16,), f32),
        'bn1_rm': jnp.zeros((16,), f32), 'bn1_rv': jnp.ones((16,), f32),
        'conv2_w': jax.random.normal(ks[2], (32, 16, 3), f32) * s,
        'conv2_b': jax.random.normal(ks[3], (32,), f32) * s,
        'bn2_g': jnp.ones((32,), f32), 'bn2_b': jnp.zeros((32,), f32),
        'bn2_rm': jnp.zeros((32,), f32), 'bn2_rv': jnp.ones((32,), f32),
        'lin_w': jax.random.normal(ks[4], (d_model, (T // 4) * 32), f32) * s,
        'lin_b': jax.random.normal(ks[5], (d_model,), f32) * s,
        'wq': jax.random.normal(ks[6], (d_model, d_model), f32) * s,
        'wk': jax.random.normal(ks[7], (d_model, d_model), f32) * s,
        'wv': jax.random.normal(ks[8], (d_model, d_model), f32) * s,
        'bq': jax.random.normal(ks[9], (d_model,), f32) * s,
        'bk': jax.random.normal(ks[10], (d_model,), f32) * s,
        'bv': jax.random.normal(ks[11], (d_model,), f32) * s,
        'wo': jax.random.normal(ks[12], (d_model, d_model), f32) * s,
        'bo': jax.random.normal(ks[13], (d_model,), f32) * s,
        'ln1_g': jnp.ones((d_model,), f32), 'ln1_b': jnp.zeros((d_model,), f32),
        'ffn1_w': jax.random.normal(ks[14], (dff, d_model), f32) * s,
        'ffn1_b': jax.random.normal(ks[15], (dff,), f32) * s,
        'ffn2_w': jax.random.normal(ks[16], (d_model, dff), f32) * s,
        'ffn2_b': jax.random.normal(ks[17], (d_model,), f32) * s,
        'ln2_g': jnp.ones((d_model,), f32), 'ln2_b': jnp.zeros((d_model,), f32),
        'cls_w': jax.random.normal(ks[18], (n_classes, d_model), f32) * s,
        'cls_b': jax.random.normal(ks[19], (n_classes,), f32) * s,
    }
    return P


if __name__ == "__main__":
    B, C, T = 2, 4, 16          # input_shape = (4, 16), batch = 2
    n_classes = 2
    key = jax.random.PRNGKey(0)
    kx, kp = jax.random.split(key)
    x = jax.random.normal(kx, (B, C, T), jnp.float32)
    P = init_params(kp, n_classes, (C, T))

    out = hybrid_forward_pallas(x, P)
    out = jax.block_until_ready(out)
    assert out.shape == (B, n_classes)

    ref = hybrid_forward_reference(x, P)
    np.testing.assert_allclose(np.asarray(out), np.asarray(ref), rtol=2e-2, atol=2e-2)

    print("KERNEL_OK")
</pallas_src>

<mosaic_0001>
module attributes {stable_mosaic.version = 11 : i64} {
  func.func @kernel(%arg0: i32, %arg1: memref<32x4xf32, #tpu.memory_space<vmem>>, %arg2: memref<12x16xf32, #tpu.memory_space<vmem>>, %arg3: memref<48x32xf32, #tpu.memory_space<vmem>>, %arg4: memref<132x16xf32, #tpu.memory_space<vmem>>, %arg5: memref<16x66xf32, #tpu.memory_space<vmem>>, %arg6: memref<1x2258xf32, #tpu.memory_space<vmem>>, %arg7: memref<16x2048xbf16, #tpu.memory_space<any>>, %arg8: memref<2048x16xbf16, #tpu.memory_space<any>>, %arg9: memref<4x2xf32, #tpu.memory_space<vmem>>, %arg10: memref<16x2048xbf16, #tpu.memory_space<vmem>>, %arg11: memref<2048x16xbf16, #tpu.memory_space<vmem>>, %arg12: memref<2x!tpu.dma_semaphore, #tpu.memory_space<semaphore_mem>>) attributes {dimension_semantics = [#tpu.dimension_semantics<arbitrary>], iteration_bounds = array<i64: 1>, scalar_prefetch = 0 : i64, scratch_operands = 3 : i64, tpu.core_type = #tpu.core_type<tc>, window_params = [{pipeline_mode = #tpu.pipeline_mode<synchronous>, transform_indices = @transform_0, window_bounds = array<i64: 32, 4>}, {pipeline_mode = #tpu.pipeline_mode<synchronous>, transform_indices = @transform_1, window_bounds = array<i64: 12, 16>}, {pipeline_mode = #tpu.pipeline_mode<synchronous>, transform_indices = @transform_2, window_bounds = array<i64: 48, 32>}, {pipeline_mode = #tpu.pipeline_mode<synchronous>, transform_indices = @transform_3, window_bounds = array<i64: 132, 16>}, {pipeline_mode = #tpu.pipeline_mode<synchronous>, transform_indices = @transform_4, window_bounds = array<i64: 16, 66>}, {pipeline_mode = #tpu.pipeline_mode<synchronous>, transform_indices = @transform_5, window_bounds = array<i64: 1, 2258>}, {}, {}, {pipeline_mode = #tpu.pipeline_mode<synchronous>, transform_indices = @transform_8, window_bounds = array<i64: 4, 2>}]} {
    %c0_i32 = arith.constant 0 : i32
    %0 = tpu.memref_slice %arg12[%c0_i32] : memref<2x!tpu.dma_semaphore, #tpu.memory_space<semaphore_mem>> -> memref<1x!tpu.dma_semaphore, #tpu.memory_space<semaphore_mem>>
    %1 = tpu.memref_squeeze %0 : memref<1x!tpu.dma_semaphore, #tpu.memory_space<semaphore_mem>> -> memref<!tpu.dma_semaphore, #tpu.memory_space<semaphore_mem>>
    tpu.enqueue_dma source(%arg7 : memref<16x2048xbf16, #tpu.memory_space<any>>) target(%arg10 : memref<16x2048xbf16, #tpu.memory_space<vmem>>) target_semaphore(%1 : memref<!tpu.dma_semaphore, #tpu.memory_space<semaphore_mem>>)
    %c1_i32 = arith.constant 1 : i32
    %2 = tpu.memref_slice %arg12[%c1_i32] : memref<2x!tpu.dma_semaphore, #tpu.memory_space<semaphore_mem>> -> memref<1x!tpu.dma_semaphore, #tpu.memory_space<semaphore_mem>>
    %3 = tpu.memref_squeeze %2 : memref<1x!tpu.dma_semaphore, #tpu.memory_space<semaphore_mem>> -> memref<!tpu.dma_semaphore, #tpu.memory_space<semaphore_mem>>
    tpu.enqueue_dma source(%arg8 : memref<2048x16xbf16, #tpu.memory_space<any>>) target(%arg11 : memref<2048x16xbf16, #tpu.memory_space<vmem>>) target_semaphore(%3 : memref<!tpu.dma_semaphore, #tpu.memory_space<semaphore_mem>>)
    %c0 = arith.constant 0 : index
    %c0_0 = arith.constant 0 : index
    %4 = vector.load %arg1[%c0, %c0_0] : memref<32x4xf32, #tpu.memory_space<vmem>>, vector<32x4xf32>
    %cst = arith.constant 0.000000e+00 : f32
    %5 = vector.broadcast %cst : f32 to vector<2x4xf32>
    %6 = vector.extract_strided_slice %4 {offsets = [0, 0], sizes = [30, 4], strides = [1, 1]} : vector<32x4xf32> to vector<30x4xf32>
    %7 = tpu.concatenate %5, %6 in 0 : vector<2x4xf32>, vector<30x4xf32> -> vector<32x4xf32>
    %8 = vector.extract_strided_slice %4 {offsets = [2, 0], sizes = [30, 4], strides = [1, 1]} : vector<32x4xf32> to vector<30x4xf32>
    %9 = tpu.concatenate %8, %5 in 0 : vector<30x4xf32>, vector<2x4xf32> -> vector<32x4xf32>
    %10 = tpu.concatenate %7, %4, %9 in 1 : vector<32x4xf32>, vector<32x4xf32>, vector<32x4xf32> -> vector<32x12xf32>
    %c0_1 = arith.constant 0 : index
    %c0_2 = arith.constant 0 : index
    %11 = vector.load %arg2[%c0_1, %c0_2] : memref<12x16xf32, #tpu.memory_space<vmem>>, vector<12x16xf32>
    %cst_3 = arith.constant dense<0.000000e+00> : vector<32x16xf32>
    %12 = tpu.matmul %10, %11, %cst_3 {dimension_numbers = #tpu.dot_dimension_numbers<[1], [0], [0], [1], [0, 0, 1, 1], [], []>} : vector<32x12xf32>, vector<12x16xf32>, vector<32x16xf32> -> vector<32x16xf32>
    %c0_4 = arith.constant 0 : index
    %c2048 = arith.constant 2048 : index
    %13 = vector.load %arg6[%c0_4, %c2048] : memref<1x2258xf32, #tpu.memory_space<vmem>>, vector<1x16xf32>
    %14 = vector.broadcast %13 : vector<1x16xf32> to vector<32x16xf32>
    %15 = arith.addf %12, %14 : vector<32x16xf32>
    %cst_5 = arith.constant 0.000000e+00 : f32
    %16 = vector.broadcast %cst_5 : f32 to vector<32x16xf32>
    %17 = arith.maximumf %15, %16 : vector<32x16xf32>
    %18 = vector.extract_strided_slice %17 {offsets = [2, 0], sizes = [30, 16], strides = [1, 1]} : vector<32x16xf32> to vector<30x16xf32>
    %cst_6 = arith.constant 0.000000e+00 : f32
    %19 = vector.broadcast %cst_6 : f32 to vector<2x16xf32>
    %20 = tpu.concatenate %18, %19 in 0 : vector<30x16xf32>, vector<2x16xf32> -> vector<32x16xf32>
    %21 = arith.maximumf %17, %20 : vector<32x16xf32>
    %cst_7 = arith.constant 0.000000e+00 : f32
    %22 = vector.broadcast %cst_7 : f32 to vector<4x16xf32>
    %23 = vector.extract_strided_slice %21 {offsets = [0, 0], sizes = [28, 16], strides = [1, 1]} : vector<32x16xf32> to vector<28x16xf32>
    %24 = tpu.concatenate %22, %23 in 0 : vector<4x16xf32>, vector<28x16xf32> -> vector<32x16xf32>
    %25 = vector.extract_strided_slice %21 {offsets = [4, 0], sizes = [28, 16], strides = [1, 1]} : vector<32x16xf32> to vector<28x16xf32>
    %26 = tpu.concatenate %25, %22 in 0 : vector<28x16xf32>, vector<4x16xf32> -> vector<32x16xf32>
    %27 = tpu.concatenate %24, %21, %26 in 1 : vector<32x16xf32>, vector<32x16xf32>, vector<32x16xf32> -> vector<32x48xf32>
    %c0_8 = arith.constant 0 : index
    %c0_9 = arith.constant 0 : index
    %28 = vector.load %arg3[%c0_8, %c0_9] : memref<48x32xf32, #tpu.memory_space<vmem>>, vector<48x32xf32>
    %cst_10 = arith.constant dense<0.000000e+00> : vector<32x32xf32>
    %29 = tpu.matmul %27, %28, %cst_10 {dimension_numbers = #tpu.dot_dimension_numbers<[1], [0], [0], [1], [0, 0, 1, 1], [], []>} : vector<32x48xf32>, vector<48x32xf32>, vector<32x32xf32> -> vector<32x32xf32>
    %c0_11 = arith.constant 0 : index
    %c2064 = arith.constant 2064 : index
    %30 = vector.load %arg6[%c0_11, %c2064] : memref<1x2258xf32, #tpu.memory_space<vmem>>, vector<1x32xf32>
    %31 = vector.broadcast %30 : vector<1x32xf32> to vector<32x32xf32>
    %32 = arith.addf %29, %31 : vector<32x32xf32>
    %cst_12 = arith.constant 0.000000e+00 : f32
    %33 = vector.broadcast %cst_12 : f32 to vector<32x32xf32>
    %34 = arith.maximumf %32, %33 : vector<32x32xf32>
    %35 = vector.extract_strided_slice %34 {offsets = [4, 0], sizes = [28, 32], strides = [1, 1]} : vector<32x32xf32> to vector<28x32xf32>
    %cst_13 = arith.constant 0.000000e+00 : f32
    %36 = vector.broadcast %cst_13 : f32 to vector<4x32xf32>
    %37 = tpu.concatenate %35, %36 in 0 : vector<28x32xf32>, vector<4x32xf32> -> vector<32x32xf32>
    %38 = arith.maximumf %34, %37 : vector<32x32xf32>
    %39 = vector.extract_strided_slice %38 {offsets = [0, 0], sizes = [2, 32], strides = [1, 1]} : vector<32x32xf32> to vector<2x32xf32>
    %40 = vector.extract_strided_slice %38 {offsets = [8, 0], sizes = [2, 32], strides = [1, 1]} : vector<32x32xf32> to vector<2x32xf32>
    %41 = vector.extract_strided_slice %38 {offsets = [16, 0], sizes = [2, 32], strides = [1, 1]} : vector<32x32xf32> to vector<2x32xf32>
    %42 = vector.extract_strided_slice %38 {offsets = [24, 0], sizes = [2, 32], strides = [1, 1]} : vector<32x32xf32> to vector<2x32xf32>
    %43 = tpu.concatenate %39, %40, %41, %42 in 1 : vector<2x32xf32>, vector<2x32xf32>, vector<2x32xf32>, vector<2x32xf32> -> vector<2x128xf32>
    %c0_14 = arith.constant 0 : index
    %c0_15 = arith.constant 0 : index
    %44 = vector.load %arg4[%c0_14, %c0_15] : memref<132x16xf32, #tpu.memory_space<vmem>>, vector<128x16xf32>
    %c128 = arith.constant 128 : index
    %c0_16 = arith.constant 0 : index
    %45 = vector.load %arg4[%c128, %c0_16] : memref<132x16xf32, #tpu.memory_space<vmem>>, vector<4x16xf32>
    %cst_17 = arith.constant dense<0.000000e+00> : vector<2x16xf32>
    %46 = tpu.matmul %43, %44, %cst_17 {dimension_numbers = #tpu.dot_dimension_numbers<[1], [0], [0], [1], [0, 0, 1, 1], [], []>} : vector<2x128xf32>, vector<128x16xf32>, vector<2x16xf32> -> vector<2x16xf32>
    %c0_18 = arith.constant 0 : index
    %c2096 = arith.constant 2096 : index
    %47 = vector.load %arg6[%c0_18, %c2096] : memref<1x2258xf32, #tpu.memory_space<vmem>>, vector<1x16xf32>
    %48 = vector.broadcast %47 : vector<1x16xf32> to vector<2x16xf32>
    %49 = arith.addf %46, %48 : vector<2x16xf32>
    %50 = tpu.concatenate %49, %49 in 0 : vector<2x16xf32>, vector<2x16xf32> -> vector<4x16xf32>
    %51 = arith.addf %50, %45 : vector<4x16xf32>
    %c0_19 = arith.constant 0 : index
    %c0_20 = arith.constant 0 : index
    %52 = vector.load %arg5[%c0_19, %c0_20] : memref<16x66xf32, #tpu.memory_space<vmem>>, vector<16x48xf32>
    %c0_21 = arith.constant 0 : index
    %c48 = arith.constant 48 : index
    %53 = vector.load %arg5[%c0_21, %c48] : memref<16x66xf32, #tpu.memory_space<vmem>>, vector<16x16xf32>
    %c0_22 = arith.constant 0 : index
    %c64 = arith.constant 64 : index
    %54 = vector.load %arg5[%c0_22, %c64] : memref<16x66xf32, #tpu.memory_space<vmem>>, vector<16x2xf32>
    %cst_23 = arith.constant dense<0.000000e+00> : vector<4x48xf32>
    %55 = tpu.matmul %51, %52, %cst_23 {dimension_numbers = #tpu.dot_dimension_numbers<[1], [0], [0], [1], [0, 0, 1, 1], [], []>} : vector<4x16xf32>, vector<16x48xf32>, vector<4x48xf32> -> vector<4x48xf32>
    %c0_24 = arith.constant 0 : index
    %c2112 = arith.constant 2112 : index
    %56 = vector.load %arg6[%c0_24, %c2112] : memref<1x2258xf32, #tpu.memory_space<vmem>>, vector<1x48xf32>
    %57 = vector.broadcast %56 : vector<1x48xf32> to vector<4x48xf32>
    %58 = arith.addf %55, %57 : vector<4x48xf32>
    %59 = vector.extract_strided_slice %58 {offsets = [0, 0], sizes = [4, 16], strides = [1, 1]} : vector<4x48xf32> to vector<4x16xf32>
    %60 = vector.extract_strided_slice %58 {offsets = [0, 16], sizes = [4, 16], strides = [1, 1]} : vector<4x48xf32> to vector<4x16xf32>
    %61 = vector.extract_strided_slice %58 {offsets = [0, 32], sizes = [4, 16], strides = [1, 1]} : vector<4x48xf32> to vector<4x16xf32>
    %62 = vector.extract_strided_slice %59 {offsets = [0, 0], sizes = [2, 8], strides = [1, 1]} : vector<4x16xf32> to vector<2x8xf32>
    %63 = vector.extract_strided_slice %60 {offsets = [0, 0], sizes = [2, 8], strides = [1, 1]} : vector<4x16xf32> to vector<2x8xf32>
    %64 = vector.extract_strided_slice %61 {offsets = [0, 0], sizes = [2, 8], strides = [1, 1]} : vector<4x16xf32> to vector<2x8xf32>
    %cst_25 = arith.constant dense<0.000000e+00> : vector<2x2xf32>
    %65 = tpu.matmul %62, %63, %cst_25 {dimension_numbers = #tpu.dot_dimension_numbers<[1], [1], [0], [0], [0, 0, 1, 0], [], []>} : vector<2x8xf32>, vector<2x8xf32>, vector<2x2xf32> -> vector<2x2xf32>
    %cst_26 = arith.constant 0.353553385 : f32
    %66 = vector.broadcast %cst_26 : f32 to vector<2x2xf32>
    %67 = arith.mulf %65, %66 : vector<2x2xf32>
    %cst_27 = arith.constant dense<0xFF800000> : vector<2xf32>
    %68 = vector.multi_reduction <maximumf>, %67, %cst_27 [1] : vector<2x2xf32> to vector<2xf32>
    %69 = vector.shape_cast %68 : vector<2xf32> to vector<2x1xf32>
    %70 = vector.broadcast %69 : vector<2x1xf32> to vector<2x2xf32>
    %71 = arith.subf %67, %70 : vector<2x2xf32>
    %72 = math.exp %71 : vector<2x2xf32>
    %cst_28 = arith.constant dense<0.000000e+00> : vector<2xf32>
    %73 = vector.multi_reduction <add>, %72, %cst_28 [1] : vector<2x2xf32> to vector<2xf32>
    %74 = vector.shape_cast %73 : vector<2xf32> to vector<2x1xf32>
    %75 = vector.broadcast %74 : vector<2x1xf32> to vector<2x2xf32>
    %76 = arith.divf %72, %75 : vector<2x2xf32>
    %cst_29 = arith.constant dense<0.000000e+00> : vector<2x8xf32>
    %77 = tpu.matmul %76, %64, %cst_29 {dimension_numbers = #tpu.dot_dimension_numbers<[1], [0], [0], [1], [0, 0, 1, 1], [], []>} : vector<2x2xf32>, vector<2x8xf32>, vector<2x8xf32> -> vector<2x8xf32>
    %78 = vector.extract_strided_slice %59 {offsets = [0, 8], sizes = [2, 8], strides = [1, 1]} : vector<4x16xf32> to vector<2x8xf32>
    %79 = vector.extract_strided_slice %60 {offsets = [0, 8], sizes = [2, 8], strides = [1, 1]} : vector<4x16xf32> to vector<2x8xf32>
    %80 = vector.extract_strided_slice %61 {offsets = [0, 8], sizes = [2, 8], strides = [1, 1]} : vector<4x16xf32> to vector<2x8xf32>
    %cst_30 = arith.constant dense<0.000000e+00> : vector<2x2xf32>
    %81 = tpu.matmul %78, %79, %cst_30 {dimension_numbers = #tpu.dot_dimension_numbers<[1], [1], [0], [0], [0, 0, 1, 0], [], []>} : vector<2x8xf32>, vector<2x8xf32>, vector<2x2xf32> -> vector<2x2xf32>
    %cst_31 = arith.constant 0.353553385 : f32
    %82 = vector.broadcast %cst_31 : f32 to vector<2x2xf32>
    %83 = arith.mulf %81, %82 : vector<2x2xf32>
    %cst_32 = arith.constant dense<0xFF800000> : vector<2xf32>
    %84 = vector.multi_reduction <maximumf>, %83, %cst_32 [1] : vector<2x2xf32> to vector<2xf32>
    %85 = vector.shape_cast %84 : vector<2xf32> to vector<2x1xf32>
    %86 = vector.broadcast %85 : vector<2x1xf32> to vector<2x2xf32>
    %87 = arith.subf %83, %86 : vector<2x2xf32>
    %88 = math.exp %87 : vector<2x2xf32>
    %cst_33 = arith.constant dense<0.000000e+00> : vector<2xf32>
    %89 = vector.multi_reduction <add>, %88, %cst_33 [1] : vector<2x2xf32> to vector<2xf32>
    %90 = vector.shape_cast %89 : vector<2xf32> to vector<2x1xf32>
    %91 = vector.broadcast %90 : vector<2x1xf32> to vector<2x2xf32>
    %92 = arith.divf %88, %91 : vector<2x2xf32>
    %cst_34 = arith.constant dense<0.000000e+00> : vector<2x8xf32>
    %93 = tpu.matmul %92, %80, %cst_34 {dimension_numbers = #tpu.dot_dimension_numbers<[1], [0], [0], [1], [0, 0, 1, 1], [], []>} : vector<2x2xf32>, vector<2x8xf32>, vector<2x8xf32> -> vector<2x8xf32>
    %94 = tpu.concatenate %77, %93 in 1 : vector<2x8xf32>, vector<2x8xf32> -> vector<2x16xf32>
    %95 = vector.extract_strided_slice %59 {offsets = [2, 0], sizes = [2, 8], strides = [1, 1]} : vector<4x16xf32> to vector<2x8xf32>
    %96 = vector.extract_strided_slice %60 {offsets = [2, 0], sizes = [2, 8], strides = [1, 1]} : vector<4x16xf32> to vector<2x8xf32>
    %97 = vector.extract_strided_slice %61 {offsets = [2, 0], sizes = [2, 8], strides = [1, 1]} : vector<4x16xf32> to vector<2x8xf32>
    %cst_35 = arith.constant dense<0.000000e+00> : vector<2x2xf32>
    %98 = tpu.matmul %95, %96, %cst_35 {dimension_numbers = #tpu.dot_dimension_numbers<[1], [1], [0], [0], [0, 0, 1, 0], [], []>} : vector<2x8xf32>, vector<2x8xf32>, vector<2x2xf32> -> vector<2x2xf32>
    %cst_36 = arith.constant 0.353553385 : f32
    %99 = vector.broadcast %cst_36 : f32 to vector<2x2xf32>
    %100 = arith.mulf %98, %99 : vector<2x2xf32>
    %cst_37 = arith.constant dense<0xFF800000> : vector<2xf32>
    %101 = vector.multi_reduction <maximumf>, %100, %cst_37 [1] : vector<2x2xf32> to vector<2xf32>
    %102 = vector.shape_cast %101 : vector<2xf32> to vector<2x1xf32>
    %103 = vector.broadcast %102 : vector<2x1xf32> to vector<2x2xf32>
    %104 = arith.subf %100, %103 : vector<2x2xf32>
    %105 = math.exp %104 : vector<2x2xf32>
    %cst_38 = arith.constant dense<0.000000e+00> : vector<2xf32>
    %106 = vector.multi_reduction <add>, %105, %cst_38 [1] : vector<2x2xf32> to vector<2xf32>
    %107 = vector.shape_cast %106 : vector<2xf32> to vector<2x1xf32>
    %108 = vector.broadcast %107 : vector<2x1xf32> to vector<2x2xf32>
    %109 = arith.divf %105, %108 : vector<2x2xf32>
    %cst_39 = arith.constant dense<0.000000e+00> : vector<2x8xf32>
    %110 = tpu.matmul %109, %97, %cst_39 {dimension_numbers = #tpu.dot_dimension_numbers<[1], [0], [0], [1], [0, 0, 1, 1], [], []>} : vector<2x2xf32>, vector<2x8xf32>, vector<2x8xf32> -> vector<2x8xf32>
    %111 = vector.extract_strided_slice %59 {offsets = [2, 8], sizes = [2, 8], strides = [1, 1]} : vector<4x16xf32> to vector<2x8xf32>
    %112 = vector.extract_strided_slice %60 {offsets = [2, 8], sizes = [2, 8], strides = [1, 1]} : vector<4x16xf32> to vector<2x8xf32>
    %113 = vector.extract_strided_slice %61 {offsets = [2, 8], sizes = [2, 8], strides = [1, 1]} : vector<4x16xf32> to vector<2x8xf32>
    %cst_40 = arith.constant dense<0.000000e+00> : vector<2x2xf32>
    %114 = tpu.matmul %111, %112, %cst_40 {dimension_numbers = #tpu.dot_dimension_numbers<[1], [1], [0], [0], [0, 0, 1, 0], [], []>} : vector<2x8xf32>, vector<2x8xf32>, vector<2x2xf32> -> vector<2x2xf32>
    %cst_41 = arith.constant 0.353553385 : f32
    %115 = vector.broadcast %cst_41 : f32 to vector<2x2xf32>
    %116 = arith.mulf %114, %115 : vector<2x2xf32>
    %cst_42 = arith.constant dense<0xFF800000> : vector<2xf32>
    %117 = vector.multi_reduction <maximumf>, %116, %cst_42 [1] : vector<2x2xf32> to vector<2xf32>
    %118 = vector.shape_cast %117 : vector<2xf32> to vector<2x1xf32>
    %119 = vector.broadcast %118 : vector<2x1xf32> to vector<2x2xf32>
    %120 = arith.subf %116, %119 : vector<2x2xf32>
    %121 = math.exp %120 : vector<2x2xf32>
    %cst_43 = arith.constant dense<0.000000e+00> : vector<2xf32>
    %122 = vector.multi_reduction <add>, %121, %cst_43 [1] : vector<2x2xf32> to vector<2xf32>
    %123 = vector.shape_cast %122 : vector<2xf32> to vector<2x1xf32>
    %124 = vector.broadcast %123 : vector<2x1xf32> to vector<2x2xf32>
    %125 = arith.divf %121, %124 : vector<2x2xf32>
    %cst_44 = arith.constant dense<0.000000e+00> : vector<2x8xf32>
    %126 = tpu.matmul %125, %113, %cst_44 {dimension_numbers = #tpu.dot_dimension_numbers<[1], [0], [0], [1], [0, 0, 1, 1], [], []>} : vector<2x2xf32>, vector<2x8xf32>, vector<2x8xf32> -> vector<2x8xf32>
    %127 = tpu.concatenate %110, %126 in 1 : vector<2x8xf32>, vector<2x8xf32> -> vector<2x16xf32>
    %128 = tpu.concatenate %94, %127 in 0 : vector<2x16xf32>, vector<2x16xf32> -> vector<4x16xf32>
    %cst_45 = arith.constant dense<0.000000e+00> : vector<4x16xf32>
    %129 = tpu.matmul %128, %53, %cst_45 {dimension_numbers = #tpu.dot_dimension_numbers<[1], [0], [0], [1], [0, 0, 1, 1], [], []>} : vector<4x16xf32>, vector<16x16xf32>, vector<4x16xf32> -> vector<4x16xf32>
    %c0_46 = arith.constant 0 : index
    %c2160 = arith.constant 2160 : index
    %130 = vector.load %arg6[%c0_46, %c2160] : memref<1x2258xf32, #tpu.memory_space<vmem>>, vector<1x16xf32>
    %131 = vector.broadcast %130 : vector<1x16xf32> to vector<4x16xf32>
    %132 = arith.addf %129, %131 : vector<4x16xf32>
    %133 = arith.addf %51, %132 : vector<4x16xf32>
    %c0_47 = arith.constant 0 : index
    %c2176 = arith.constant 2176 : index
    %134 = vector.load %arg6[%c0_47, %c2176] : memref<1x2258xf32, #tpu.memory_space<vmem>>, vector<1x16xf32>
    %c0_48 = arith.constant 0 : index
    %c2192 = arith.constant 2192 : index
    %135 = vector.load %arg6[%c0_48, %c2192] : memref<1x2258xf32, #tpu.memory_space<vmem>>, vector<1x16xf32>
    %cst_49 = arith.constant dense<0.000000e+00> : vector<4xf32>
    %136 = vector.multi_reduction <add>, %133, %cst_49 [1] : vector<4x16xf32> to vector<4xf32>
    %137 = vector.shape_cast %136 : vector<4xf32> to vector<4x1xf32>
    %cst_50 = arith.constant 1.600000e+01 : f32
    %138 = vector.broadcast %cst_50 : f32 to vector<4x1xf32>
    %139 = arith.divf %137, %138 : vector<4x1xf32>
    %140 = vector.broadcast %139 : vector<4x1xf32> to vector<4x16xf32>
    %141 = arith.subf %133, %140 : vector<4x16xf32>
    %142 = arith.mulf %141, %141 : vector<4x16xf32>
    %cst_51 = arith.constant dense<0.000000e+00> : vector<4xf32>
    %143 = vector.multi_reduction <add>, %142, %cst_51 [1] : vector<4x16xf32> to vector<4xf32>
    %144 = vector.shape_cast %143 : vector<4xf32> to vector<4x1xf32>
    %cst_52 = arith.constant 1.600000e+01 : f32
    %145 = vector.broadcast %cst_52 : f32 to vector<4x1xf32>
    %146 = arith.divf %144, %145 : vector<4x1xf32>
    %147 = vector.broadcast %139 : vector<4x1xf32> to vector<4x16xf32>
    %148 = arith.subf %133, %147 : vector<4x16xf32>
    %cst_53 = arith.constant 9.99999974E-6 : f32
    %149 = vector.broadcast %cst_53 : f32 to vector<4x1xf32>
    %150 = arith.addf %146, %149 : vector<4x1xf32>
    %151 = math.rsqrt %150 : vector<4x1xf32>
    %152 = vector.broadcast %151 : vector<4x1xf32> to vector<4x16xf32>
    %153 = arith.mulf %148, %152 : vector<4x16xf32>
    %154 = vector.broadcast %134 : vector<1x16xf32> to vector<4x16xf32>
    %155 = arith.mulf %153, %154 : vector<4x16xf32>
    %156 = vector.broadcast %135 : vector<1x16xf32> to vector<4x16xf32>
    %157 = arith.addf %155, %156 : vector<4x16xf32>
    %c0_i32_54 = arith.constant 0 : i32
    %158 = tpu.memref_slice %arg12[%c0_i32_54] : memref<2x!tpu.dma_semaphore, #tpu.memory_space<semaphore_mem>> -> memref<1x!tpu.dma_semaphore, #tpu.memory_space<semaphore_mem>>
    %159 = tpu.memref_squeeze %158 : memref<1x!tpu.dma_semaphore, #tpu.memory_space<semaphore_mem>> -> memref<!tpu.dma_semaphore, #tpu.memory_space<semaphore_mem>>
    tpu.wait_dma2 semaphore(%159 : memref<!tpu.dma_semaphore, #tpu.memory_space<semaphore_mem>>) src(%arg7 : memref<16x2048xbf16, #tpu.memory_space<any>>) dst(%arg10 : memref<16x2048xbf16, #tpu.memory_space<vmem>>)
    %c1_i32_55 = arith.constant 1 : i32
    %160 = tpu.memref_slice %arg12[%c1_i32_55] : memref<2x!tpu.dma_semaphore, #tpu.memory_space<semaphore_mem>> -> memref<1x!tpu.dma_semaphore, #tpu.memory_space<semaphore_mem>>
    %161 = tpu.memref_squeeze %160 : memref<1x!tpu.dma_semaphore, #tpu.memory_space<semaphore_mem>> -> memref<!tpu.dma_semaphore, #tpu.memory_space<semaphore_mem>>
    tpu.wait_dma2 semaphore(%161 : memref<!tpu.dma_semaphore, #tpu.memory_space<semaphore_mem>>) src(%arg8 : memref<2048x16xbf16, #tpu.memory_space<any>>) dst(%arg11 : memref<2048x16xbf16, #tpu.memory_space<vmem>>)
    %c0_56 = arith.constant 0 : index
    %c0_57 = arith.constant 0 : index
    %162 = vector.load %arg10[%c0_56, %c0_57] : memref<16x2048xbf16, #tpu.memory_space<vmem>>, vector<16x2048xbf16>
    %163 = arith.extf %162 : vector<16x2048xbf16> to vector<16x2048xf32>
    %c0_58 = arith.constant 0 : index
    %c0_59 = arith.constant 0 : index
    %164 = vector.load %arg11[%c0_58, %c0_59] : memref<2048x16xbf16, #tpu.memory_space<vmem>>, vector<2048x16xbf16>
    %165 = arith.extf %164 : vector<2048x16xbf16> to vector<2048x16xf32>
    %cst_60 = arith.constant dense<0.000000e+00> : vector<4x2048xf32>
    %166 = tpu.matmul %157, %163, %cst_60 {dimension_numbers = #tpu.dot_dimension_numbers<[1], [0], [0], [1], [0, 0, 1, 1], [], []>} : vector<4x16xf32>, vector<16x2048xf32>, vector<4x2048xf32> -> vector<4x2048xf32>
    %c0_61 = arith.constant 0 : index
    %c0_62 = arith.constant 0 : index
    %167 = vector.load %arg6[%c0_61, %c0_62] : memref<1x2258xf32, #tpu.memory_space<vmem>>, vector<1x2048xf32>
    %168 = vector.broadcast %167 : vector<1x2048xf32> to vector<4x2048xf32>
    %169 = arith.addf %166, %168 : vector<4x2048xf32>
    %cst_63 = arith.constant 0.000000e+00 : f32
    %170 = vector.broadcast %cst_63 : f32 to vector<4x2048xf32>
    %171 = arith.maximumf %169, %170 : vector<4x2048xf32>
    %cst_64 = arith.constant dense<0.000000e+00> : vector<4x16xf32>
    %172 = tpu.matmul %171, %165, %cst_64 {dimension_numbers = #tpu.dot_dimension_numbers<[1], [0], [0], [1], [0, 0, 1, 1], [], []>} : vector<4x2048xf32>, vector<2048x16xf32>, vector<4x16xf32> -> vector<4x16xf32>
    %c0_65 = arith.constant 0 : index
    %c2208 = arith.constant 2208 : index
    %173 = vector.load %arg6[%c0_65, %c2208] : memref<1x2258xf32, #tpu.memory_space<vmem>>, vector<1x16xf32>
    %174 = vector.broadcast %173 : vector<1x16xf32> to vector<4x16xf32>
    %175 = arith.addf %172, %174 : vector<4x16xf32>
    %176 = arith.addf %157, %175 : vector<4x16xf32>
    %c0_66 = arith.constant 0 : index
    %c2224 = arith.constant 2224 : index
    %177 = vector.load %arg6[%c0_66, %c2224] : memref<1x2258xf32, #tpu.memory_space<vmem>>, vector<1x16xf32>
    %c0_67 = arith.constant 0 : index
    %c2240 = arith.constant 2240 : index
    %178 = vector.load %arg6[%c0_67, %c2240] : memref<1x2258xf32, #tpu.memory_space<vmem>>, vector<1x16xf32>
    %cst_68 = arith.constant dense<0.000000e+00> : vector<4xf32>
    %179 = vector.multi_reduction <add>, %176, %cst_68 [1] : vector<4x16xf32> to vector<4xf32>
    %180 = vector.shape_cast %179 : vector<4xf32> to vector<4x1xf32>
    %cst_69 = arith.constant 1.600000e+01 : f32
    %181 = vector.broadcast %cst_69 : f32 to vector<4x1xf32>
    %182 = arith.divf %180, %181 : vector<4x1xf32>
    %183 = vector.broadcast %182 : vector<4x1xf32> to vector<4x16xf32>
    %184 = arith.subf %176, %183 : vector<4x16xf32>
    %185 = arith.mulf %184, %184 : vector<4x16xf32>
    %cst_70 = arith.constant dense<0.000000e+00> : vector<4xf32>
    %186 = vector.multi_reduction <add>, %185, %cst_70 [1] : vector<4x16xf32> to vector<4xf32>
    %187 = vector.shape_cast %186 : vector<4xf32> to vector<4x1xf32>
    %cst_71 = arith.constant 1.600000e+01 : f32
    %188 = vector.broadcast %cst_71 : f32 to vector<4x1xf32>
    %189 = arith.divf %187, %188 : vector<4x1xf32>
    %190 = vector.broadcast %182 : vector<4x1xf32> to vector<4x16xf32>
    %191 = arith.subf %176, %190 : vector<4x16xf32>
    %cst_72 = arith.constant 9.99999974E-6 : f32
    %192 = vector.broadcast %cst_72 : f32 to vector<4x1xf32>
    %193 = arith.addf %189, %192 : vector<4x1xf32>
    %194 = math.rsqrt %193 : vector<4x1xf32>
    %195 = vector.broadcast %194 : vector<4x1xf32> to vector<4x16xf32>
    %196 = arith.mulf %191, %195 : vector<4x16xf32>
    %197 = vector.broadcast %177 : vector<1x16xf32> to vector<4x16xf32>
    %198 = arith.mulf %196, %197 : vector<4x16xf32>
    %199 = vector.broadcast %178 : vector<1x16xf32> to vector<4x16xf32>
    %200 = arith.addf %198, %199 : vector<4x16xf32>
    %cst_73 = arith.constant dense<0.000000e+00> : vector<4x2xf32>
    %201 = tpu.matmul %200, %54, %cst_73 {dimension_numbers = #tpu.dot_dimension_numbers<[1], [0], [0], [1], [0, 0, 1, 1], [], []>} : vector<4x16xf32>, vector<16x2xf32>, vector<4x2xf32> -> vector<4x2xf32>
    %c0_74 = arith.constant 0 : index
    %c2256 = arith.constant 2256 : index
    %202 = vector.load %arg6[%c0_74, %c2256] : memref<1x2258xf32, #tpu.memory_space<vmem>>, vector<1x2xf32>
    %203 = vector.broadcast %202 : vector<1x2xf32> to vector<4x2xf32>
    %204 = arith.addf %201, %203 : vector<4x2xf32>
    %cst_75 = arith.constant dense<0xFF800000> : vector<4xf32>
    %205 = vector.multi_reduction <maximumf>, %204, %cst_75 [1] : vector<4x2xf32> to vector<4xf32>
    %206 = vector.shape_cast %205 : vector<4xf32> to vector<4x1xf32>
    %207 = vector.broadcast %206 : vector<4x1xf32> to vector<4x2xf32>
    %208 = arith.subf %204, %207 : vector<4x2xf32>
    %209 = math.exp %208 : vector<4x2xf32>
    %cst_76 = arith.constant dense<0.000000e+00> : vector<4xf32>
    %210 = vector.multi_reduction <add>, %209, %cst_76 [1] : vector<4x2xf32> to vector<4xf32>
    %211 = vector.shape_cast %210 : vector<4xf32> to vector<4x1xf32>
    %212 = math.log %211 : vector<4x1xf32>
    %213 = arith.addf %212, %206 : vector<4x1xf32>
    %214 = vector.broadcast %213 : vector<4x1xf32> to vector<4x2xf32>
    %215 = arith.subf %204, %214 : vector<4x2xf32>
    %c0_77 = arith.constant 0 : index
    %c0_78 = arith.constant 0 : index
    %216 = vector.load %arg9[%c0_77, %c0_78] : memref<4x2xf32, #tpu.memory_space<vmem>>, vector<4x2xf32>
    tpu.vector_store %arg9[%c0_77, %c0_78], %215 {strides = array<i32>} : memref<4x2xf32, #tpu.memory_space<vmem>>, vector<4x2xf32>,
    return
  }
  func.func @transform_0(%arg0: i32) -> (i32, i32) {
    %c0_i32 = arith.constant 0 : i32
    %c0_i32_0 = arith.constant 0 : i32
    %c0_i32_1 = arith.constant 0 : i32
    return %c0_i32, %c0_i32_0 : i32, i32
  }
  func.func @transform_1(%arg0: i32) -> (i32, i32) {
    %c0_i32 = arith.constant 0 : i32
    %c0_i32_0 = arith.constant 0 : i32
    %c0_i32_1 = arith.constant 0 : i32
    return %c0_i32, %c0_i32_0 : i32, i32
  }
  func.func @transform_2(%arg0: i32) -> (i32, i32) {
    %c0_i32 = arith.constant 0 : i32
    %c0_i32_0 = arith.constant 0 : i32
    %c0_i32_1 = arith.constant 0 : i32
    return %c0_i32, %c0_i32_0 : i32, i32
  }
  func.func @transform_3(%arg0: i32) -> (i32, i32) {
    %c0_i32 = arith.constant 0 : i32
    %c0_i32_0 = arith.constant 0 : i32
    %c0_i32_1 = arith.constant 0 : i32
    return %c0_i32, %c0_i32_0 : i32, i32
  }
  func.func @transform_4(%arg0: i32) -> (i32, i32) {
    %c0_i32 = arith.constant 0 : i32
    %c0_i32_0 = arith.constant 0 : i32
    %c0_i32_1 = arith.constant 0 : i32
    return %c0_i32, %c0_i32_0 : i32, i32
  }
  func.func @transform_5(%arg0: i32) -> (i32, i32) {
    %c0_i32 = arith.constant 0 : i32
    %c0_i32_0 = arith.constant 0 : i32
    %c0_i32_1 = arith.constant 0 : i32
    return %c0_i32, %c0_i32_0 : i32, i32
  }
  func.func @transform_8(%arg0: i32) -> (i32, i32) {
    %c0_i32 = arith.constant 0 : i32
    %c0_i32_0 = arith.constant 0 : i32
    %c0_i32_1 = arith.constant 0 : i32
    return %c0_i32, %c0_i32_0 : i32, i32
  }
}

</mosaic_0001>

<bundles_post_ra>
// kernel: tpu_custom_call.1
= control target key start
LH: loop header
LB: loop body
LE: loop exit
PB: predicated region body
PF: predicated region fallthrough
CT: control target
= control target key end

     0   :  { %s5941_s0 = inlined_call_operand.vmem [shape: f32[32,4], index: 0, kind: input, shape index: {}]   ;;  %s5942_s1 = inlined_call_operand.vmem [shape: f32[12,16], index: 1, kind: input, shape index: {}]   ;;  %s5943_s2 = inlined_call_operand.vmem [shape: f32[48,32], index: 2, kind: input, shape index: {}]   ;;  %s5944_s3 = inlined_call_operand.vmem [shape: f32[132,16], index: 3, kind: input, shape index: {}]   ;;  %s5945_s4 = inlined_call_operand.vmem [shape: f32[16,66], index: 4, kind: input, shape index: {}]   ;;  %s5946_s5 = inlined_call_operand.vmem [shape: f32[1,2258], index: 5, kind: input, shape index: {}]   ;;  %s5947_s6 = inlined_call_operand.vmem [shape: bf16[16,2048], index: 6, kind: input, shape index: {}]   ;;  %s5948_s7 = inlined_call_operand.vmem [shape: bf16[2048,16], index: 7, kind: input, shape index: {}]   ;;  %s5949_s8 = inlined_call_operand.vmem [shape: f32[4,2], index: 8, kind: output, shape index: {}]  }
   0x1   :  { %v42_v0 = vld [vmem:[%s5947_s6] sm:$0xf]  ;;  %v46_v2 = vld [vmem:[%s5947_s6 + $0x4] sm:$0xf]  ;;  %v50_v4 = vld [vmem:[%s5947_s6 + $0x8] sm:$0xf] }
   0x2   :  { %v44_v1 = vld [vmem:[%s5947_s6 + $0x40] sm:$0xf]  ;;  %43 = vst [vmem:[#allocation2] sm:$0xf] %v42_v0  ;;  %47 = vst [vmem:[#allocation2 + $0x8] sm:$0xf] %v46_v2 }
   0x3   :  { %45 = vst [vmem:[#allocation2 + $0x4] sm:$0xf] %v44_v1  ;;  %v48_v3 = vld [vmem:[%s5947_s6 + $0x44] sm:$0xf]  ;;  %v52_v5 = vld [vmem:[%s5947_s6 + $0x48] sm:$0xf] }
   0x4   :  { %49 = vst [vmem:[#allocation2 + $0xc] sm:$0xf] %v48_v3  ;;  %51 = vst [vmem:[#allocation2 + $0x10] sm:$0xf] %v50_v4  ;;  %v54_v6 = vld [vmem:[%s5947_s6 + $0xc] sm:$0xf] }
   0x5   :  { %53 = vst [vmem:[#allocation2 + $0x14] sm:$0xf] %v52_v5  ;;  %v56_v7 = vld [vmem:[%s5947_s6 + $0x4c] sm:$0xf]  ;;  %v58_v8 = vld [vmem:[%s5947_s6 + $0x10] sm:$0xf] }
   0x6   :  { %55 = vst [vmem:[#allocation2 + $0x18] sm:$0xf] %v54_v6  ;;  %57 = vst [vmem:[#allocation2 + $0x1c] sm:$0xf] %v56_v7  ;;  %v60_v9 = vld [vmem:[%s5947_s6 + $0x50] sm:$0xf] }
   0x7   :  { %59 = vst [vmem:[#allocation2 + $0x20] sm:$0xf] %v58_v8  ;;  %v62_v10 = vld [vmem:[%s5947_s6 + $0x14] sm:$0xf]  ;;  %61 = vst [vmem:[#allocation2 + $0x24] sm:$0xf] %v60_v9 }
   0x8   :  { %v64_v11 = vld [vmem:[%s5947_s6 + $0x54] sm:$0xf]  ;;  %63 = vst [vmem:[#allocation2 + $0x28] sm:$0xf] %v62_v10  ;;  %v66_v12 = vld [vmem:[%s5947_s6 + $0x18] sm:$0xf] }
   0x9   :  { %65 = vst [vmem:[#allocation2 + $0x2c] sm:$0xf] %v64_v11  ;;  %v68_v13 = vld [vmem:[%s5947_s6 + $0x58] sm:$0xf]  ;;  %v70_v14 = vld [vmem:[%s5947_s6 + $0x1c] sm:$0xf] }
   0xa   :  { %67 = vst [vmem:[#allocation2 + $0x30] sm:$0xf] %v66_v12  ;;  %69 = vst [vmem:[#allocation2 + $0x34] sm:$0xf] %v68_v13  ;;  %v72_v15 = vld [vmem:[%s5947_s6 + $0x5c] sm:$0xf] }
   0xb   :  { %71 = vst [vmem:[#allocation2 + $0x38] sm:$0xf] %v70_v14  ;;  %v74_v16 = vld [vmem:[%s5947_s6 + $0x20] sm:$0xf]  ;;  %73 = vst [vmem:[#allocation2 + $0x3c] sm:$0xf] %v72_v15 }
   0xc   :  { %v76_v17 = vld [vmem:[%s5947_s6 + $0x60] sm:$0xf]  ;;  %75 = vst [vmem:[#allocation2 + $0x40] sm:$0xf] %v74_v16  ;;  %v78_v18 = vld [vmem:[%s5947_s6 + $0x24] sm:$0xf] }
   0xd   :  { %77 = vst [vmem:[#allocation2 + $0x44] sm:$0xf] %v76_v17  ;;  %v80_v19 = vld [vmem:[%s5947_s6 + $0x64] sm:$0xf]  ;;  %v82_v20 = vld [vmem:[%s5947_s6 + $0x28] sm:$0xf] }
   0xe   :  { %79 = vst [vmem:[#allocation2 + $0x48] sm:$0xf] %v78_v18  ;;  %81 = vst [vmem:[#allocation2 + $0x4c] sm:$0xf] %v80_v19  ;;  %v84_v21 = vld [vmem:[%s5947_s6 + $0x68] sm:$0xf] }
   0xf   :  { %83 = vst [vmem:[#allocation2 + $0x50] sm:$0xf] %v82_v20  ;;  %v86_v22 = vld [vmem:[%s5947_s6 + $0x2c] sm:$0xf]  ;;  %85 = vst [vmem:[#allocation2 + $0x54] sm:$0xf] %v84_v21 }
  0x10   :  { %v88_v23 = vld [vmem:[%s5947_s6 + $0x6c] sm:$0xf]  ;;  %87 = vst [vmem:[#allocation2 + $0x58] sm:$0xf] %v86_v22  ;;  %v90_v24 = vld [vmem:[%s5947_s6 + $0x30] sm:$0xf] }
  0x11   :  { %89 = vst [vmem:[#allocation2 + $0x5c] sm:$0xf] %v88_v23  ;;  %v92_v25 = vld [vmem:[%s5947_s6 + $0x70] sm:$0xf]  ;;  %v94_v26 = vld [vmem:[%s5947_s6 + $0x34] sm:$0xf] }
  0x12   :  { %91 = vst [vmem:[#allocation2 + $0x60] sm:$0xf] %v90_v24  ;;  %93 = vst [vmem:[#allocation2 + $0x64] sm:$0xf] %v92_v25  ;;  %v96_v27 = vld [vmem:[%s5947_s6 + $0x74] sm:$0xf] }
  0x13   :  { %95 = vst [vmem:[#allocation2 + $0x68] sm:$0xf] %v94_v26  ;;  %v98_v28 = vld [vmem:[%s5947_s6 + $0x38] sm:$0xf]  ;;  %97 = vst [vmem:[#allocation2 + $0x6c] sm:$0xf] %v96_v27 }
  0x14   :  { %v100_v29 = vld [vmem:[%s5947_s6 + $0x78] sm:$0xf]  ;;  %99 = vst [vmem:[#allocation2 + $0x70] sm:$0xf] %v98_v28  ;;  %v102_v30 = vld [vmem:[%s5947_s6 + $0x3c] sm:$0xf] }
  0x15   :  { %101 = vst [vmem:[#allocation2 + $0x74] sm:$0xf] %v100_v29  ;;  %v104_v31 = vld [vmem:[%s5947_s6 + $0x7c] sm:$0xf]  ;;  %103 = vst [vmem:[#allocation2 + $0x78] sm:$0xf] %v102_v30 }
  0x16   :  { %105 = vst [vmem:[#allocation2 + $0x7c] sm:$0xf] %v104_v31 }
  0x17   :  { %200 = vsyncadd [#allocation4], 2048  ;;  %v4761_v32 = vld [vmem:[%s5948_s7] sm:$0xff]  ;;  %v4766_v33 = vld [vmem:[%s5948_s7 + $0x8] sm:$0xff]  ;;  %vm519_vm0 = vcmask 1045504   ;;  %s4601_s11 = smov 4  }
  0x18   :  { %v4771_v34 = vld [vmem:[%s5948_s7 + $0x10] sm:$0xff]  ;;  %v4776_v35 = vld [vmem:[%s5948_s7 + $0x18] sm:$0xff]  ;;  %v4781_v36 = vld [vmem:[%s5948_s7 + $0x20] sm:$0xff] }
  0x19   :  { %v4786_v37 = vld [vmem:[%s5948_s7 + $0x28] sm:$0xff]  ;;  %v4791_v38 = vld [vmem:[%s5948_s7 + $0x30] sm:$0xff]  ;;  %v4796_v39 = vld [vmem:[%s5948_s7 + $0x38] sm:$0xff] }
  0x1a   :  { %v4801_v40 = vld [vmem:[%s5948_s7 + $0x40] sm:$0xff]  ;;  %v4806_v41 = vld [vmem:[%s5948_s7 + $0x48] sm:$0xff]  ;;  %v4811_v42 = vld [vmem:[%s5948_s7 + $0x50] sm:$0xff] }
  0x1b   :  { %v4816_v43 = vld [vmem:[%s5948_s7 + $0x58] sm:$0xff]  ;;  %v4821_v44 = vld [vmem:[%s5948_s7 + $0x60] sm:$0xff]  ;;  %v4826_v45 = vld [vmem:[%s5948_s7 + $0x68] sm:$0xff] }
  0x1c   :  { %v4831_v46 = vld [vmem:[%s5948_s7 + $0x70] sm:$0xff]  ;;  %v4836_v47 = vld [vmem:[%s5948_s7 + $0x78] sm:$0xff]  ;;  %v4841_v48 = vld [vmem:[%s5948_s7 + $0x80] sm:$0xff] }
  0x1d   :  { %v4846_v49 = vld [vmem:[%s5948_s7 + $0x88] sm:$0xff]  ;;  %v4851_v50 = vld [vmem:[%s5948_s7 + $0x90] sm:$0xff]  ;;  %v4856_v51 = vld [vmem:[%s5948_s7 + $0x98] sm:$0xff] }
  0x1e   :  { %v4861_v52 = vld [vmem:[%s5948_s7 + $0xa0] sm:$0xff]  ;;  %v4866_v53 = vld [vmem:[%s5948_s7 + $0xa8] sm:$0xff]  ;;  %v4871_v54 = vld [vmem:[%s5948_s7 + $0xb0] sm:$0xff] }
  0x1f   :  { %v4876_v55 = vld [vmem:[%s5948_s7 + $0xb8] sm:$0xff]  ;;  %v4881_v56 = vld [vmem:[%s5948_s7 + $0xc0] sm:$0xff]  ;;  %v4886_v57 = vld [vmem:[%s5948_s7 + $0xc8] sm:$0xff] }
  0x20   :  { %v4891_v58 = vld [vmem:[%s5948_s7 + $0xd0] sm:$0xff]  ;;  %v4896_v59 = vld [vmem:[%s5948_s7 + $0xd8] sm:$0xff]  ;;  %v4901_v60 = vld [vmem:[%s5948_s7 + $0xe0] sm:$0xff] }
  0x21   :  { %v4906_v61 = vld [vmem:[%s5948_s7 + $0xe8] sm:$0xff]  ;;  %v4911_v62 = vld [vmem:[%s5948_s7 + $0xf0] sm:$0xff]  ;;  %v4916_v63 = vld [vmem:[%s5948_s7 + $0xf8] sm:$0xff] }
  0x22   :  { %v4921_v0 = vld [vmem:[%s5948_s7 + $0x100] sm:$0xff]  ;;  %v4926_v1 = vld [vmem:[%s5948_s7 + $0x108] sm:$0xff]  ;;  %v4931_v2 = vld [vmem:[%s5948_s7 + $0x110] sm:$0xff] }
  0x23   :  { %5953 = vst [vmem:[#allocation9_spill] sm:$0xff] %v4931_v2  ;;  %v4936_v3 = vld [vmem:[%s5948_s7 + $0x118] sm:$0xff]  ;;  %v4941_v4 = vld [vmem:[%s5948_s7 + $0x120] sm:$0xff]  ;;  %v4946_v5 = vld [vmem:[%s5948_s7 + $0x128] sm:$0xff] }
  0x24   :  { %5954 = vst [vmem:[#allocation10_spill] sm:$0xff] %v4936_v3  ;;  %5955 = vst [vmem:[#allocation11_spill] sm:$0xff] %v4941_v4  ;;  %v4951_v6 = vld [vmem:[%s5948_s7 + $0x130] sm:$0xff]  ;;  %v4956_v7 = vld [vmem:[%s5948_s7 + $0x138] sm:$0xff] }
  0x25   :  { %5956 = vst [vmem:[#allocation12_spill] sm:$0xff] %v4946_v5  ;;  %5957 = vst [vmem:[#allocation13_spill] sm:$0xff] %v4951_v6  ;;  %v4961_v8 = vld [vmem:[%s5948_s7 + $0x140] sm:$0xff]  ;;  %v4966_v9 = vld [vmem:[%s5948_s7 + $0x148] sm:$0xff] }
  0x26   :  { %5958 = vst [vmem:[#allocation14_spill] sm:$0xff] %v4956_v7  ;;  %v4971_v10 = vld [vmem:[%s5948_s7 + $0x150] sm:$0xff]  ;;  %v4976_v11 = vld [vmem:[%s5948_s7 + $0x158] sm:$0xff]  ;;  %v4981_v12 = vld [vmem:[%s5948_s7 + $0x160] sm:$0xff] }
  0x27   :  { %5959 = vst [vmem:[#allocation15_spill] sm:$0xff] %v4976_v11  ;;  %5960 = vst [vmem:[#allocation16_spill] sm:$0xff] %v4981_v12  ;;  %v4986_v13 = vld [vmem:[%s5948_s7 + $0x168] sm:$0xff]  ;;  %v4991_v14 = vld [vmem:[%s5948_s7 + $0x170] sm:$0xff] }
  0x28   :  { %5961 = vst [vmem:[#allocation17_spill] sm:$0xff] %v4986_v13  ;;  %5962 = vst [vmem:[#allocation18_spill] sm:$0xff] %v4991_v14  ;;  %v4996_v15 = vld [vmem:[%s5948_s7 + $0x178] sm:$0xff]  ;;  %v5001_v16 = vld [vmem:[%s5948_s7 + $0x180] sm:$0xff] }
  0x29   :  { %5963 = vst [vmem:[#allocation19_spill] sm:$0xff] %v4996_v15  ;;  %v5006_v17 = vld [vmem:[%s5948_s7 + $0x188] sm:$0xff]  ;;  %v5011_v18 = vld [vmem:[%s5948_s7 + $0x190] sm:$0xff]  ;;  %v5016_v19 = vld [vmem:[%s5948_s7 + $0x198] sm:$0xff] }
  0x2a   :  { %5964 = vst [vmem:[#allocation20_spill] sm:$0xff] %v5011_v18  ;;  %5965 = vst [vmem:[#allocation21_spill] sm:$0xff] %v5016_v19  ;;  %v5021_v20 = vld [vmem:[%s5948_s7 + $0x1a0] sm:$0xff]  ;;  %v5026_v21 = vld [vmem:[%s5948_s7 + $0x1a8] sm:$0xff] }
  0x2b   :  { %5966 = vst [vmem:[#allocation22_spill] sm:$0xff] %v5021_v20  ;;  %5967 = vst [vmem:[#allocation23_spill] sm:$0xff] %v5026_v21  ;;  %v5031_v22 = vld [vmem:[%s5948_s7 + $0x1b0] sm:$0xff]  ;;  %v5036_v23 = vld [vmem:[%s5948_s7 + $0x1b8] sm:$0xff] }
  0x2c   :  { %5968 = vst [vmem:[#allocation24_spill] sm:$0xff] %v5031_v22  ;;  %5969 = vst [vmem:[#allocation25_spill] sm:$0xff] %v5036_v23  ;;  %v5041_v24 = vld [vmem:[%s5948_s7 + $0x1c0] sm:$0xff]  ;;  %v5046_v25 = vld [vmem:[%s5948_s7 + $0x1c8] sm:$0xff] }
  0x2d   :  { %v5051_v26 = vld [vmem:[%s5948_s7 + $0x1d0] sm:$0xff]  ;;  %v5056_v27 = vld [vmem:[%s5948_s7 + $0x1d8] sm:$0xff]  ;;  %v5061_v28 = vld [vmem:[%s5948_s7 + $0x1e0] sm:$0xff] }
  0x2e   :  { %5970 = vst [vmem:[#allocation26_spill] sm:$0xff] %v5051_v26  ;;  %5971 = vst [vmem:[#allocation27_spill] sm:$0xff] %v5056_v27  ;;  %v5066_v29 = vld [vmem:[%s5948_s7 + $0x1e8] sm:$0xff]  ;;  %v5071_v30 = vld [vmem:[%s5948_s7 + $0x1f0] sm:$0xff] }
  0x2f   :  { %5972 = vst [vmem:[#allocation28_spill] sm:$0xff] %v5061_v28  ;;  %5973 = vst [vmem:[#allocation29_spill] sm:$0xff] %v5066_v29  ;;  %v5076_v31 = vld [vmem:[%s5948_s7 + $0x1f8] sm:$0xff]  ;;  %v5081_v23 = vld [vmem:[%s5948_s7 + $0x200] sm:$0xff] }
  0x30   :  { %5974 = vst [vmem:[#allocation30_spill] sm:$0xff] %v5071_v30  ;;  %5975 = vst [vmem:[#allocation31_spill] sm:$0xff] %v5076_v31  ;;  %v5086_v7 = vld [vmem:[%s5948_s7 + $0x208] sm:$0xff]  ;;  %v5091_v15 = vld [vmem:[%s5948_s7 + $0x210] sm:$0xff] }
  0x31   :  { %5976 = vst [vmem:[#allocation32_spill] sm:$0xff] %v5081_v23  ;;  %5977 = vst [vmem:[#allocation33_spill] sm:$0xff] %v5086_v7  ;;  %v5096_v22 = vld [vmem:[%s5948_s7 + $0x218] sm:$0xff]  ;;  %v5101_v31 = vld [vmem:[%s5948_s7 + $0x220] sm:$0xff] }
  0x32   :  { %5978 = vst [vmem:[#allocation34_spill] sm:$0xff] %v5091_v15  ;;  %5979 = vst [vmem:[#allocation35_spill] sm:$0xff] %v5096_v22  ;;  %v5106_v23 = vld [vmem:[%s5948_s7 + $0x228] sm:$0xff]  ;;  %v5111_v7 = vld [vmem:[%s5948_s7 + $0x230] sm:$0xff] }
  0x33   :  { %5980 = vst [vmem:[#allocation36_spill] sm:$0xff] %v5101_v31  ;;  %5981 = vst [vmem:[#allocation37_spill] sm:$0xff] %v5106_v23  ;;  %v5116_v15 = vld [vmem:[%s5948_s7 + $0x238] sm:$0xff]  ;;  %v5121_v22 = vld [vmem:[%s5948_s7 + $0x240] sm:$0xff] }
  0x34   :  { %5982 = vst [vmem:[#allocation38_spill] sm:$0xff] %v5111_v7  ;;  %5983 = vst [vmem:[#allocation39_spill] sm:$0xff] %v5116_v15  ;;  %v5126_v31 = vld [vmem:[%s5948_s7 + $0x248] sm:$0xff]  ;;  %v5131_v23 = vld [vmem:[%s5948_s7 + $0x250] sm:$0xff] }
  0x35   :  { %5984 = vst [vmem:[#allocation40_spill] sm:$0xff] %v5121_v22  ;;  %5985 = vst [vmem:[#allocation41_spill] sm:$0xff] %v5126_v31  ;;  %v5136_v7 = vld [vmem:[%s5948_s7 + $0x258] sm:$0xff]  ;;  %v5141_v15 = vld [vmem:[%s5948_s7 + $0x260] sm:$0xff] }
  0x36   :  { %5986 = vst [vmem:[#allocation42_spill] sm:$0xff] %v5131_v23  ;;  %5987 = vst [vmem:[#allocation43_spill] sm:$0xff] %v5136_v7  ;;  %v5146_v22 = vld [vmem:[%s5948_s7 + $0x268] sm:$0xff]  ;;  %v5151_v31 = vld [vmem:[%s5948_s7 + $0x270] sm:$0xff] }
  0x37   :  { %5988 = vst [vmem:[#allocation44_spill] sm:$0xff] %v5141_v15  ;;  %5989 = vst [vmem:[#allocation45_spill] sm:$0xff] %v5146_v22  ;;  %v5156_v23 = vld [vmem:[%s5948_s7 + $0x278] sm:$0xff]  ;;  %v5161_v7 = vld [vmem:[%s5948_s7 + $0x280] sm:$0xff] }
  0x38   :  { %5990 = vst [vmem:[#allocation46_spill] sm:$0xff] %v5151_v31  ;;  %5991 = vst [vmem:[#allocation47_spill] sm:$0xff] %v5156_v23  ;;  %v5166_v15 = vld [vmem:[%s5948_s7 + $0x288] sm:$0xff]  ;;  %v5171_v22 = vld [vmem:[%s5948_s7 + $0x290] sm:$0xff] }
  0x39   :  { %5992 = vst [vmem:[#allocation48_spill] sm:$0xff] %v5161_v7  ;;  %5993 = vst [vmem:[#allocation49_spill] sm:$0xff] %v5166_v15  ;;  %v5176_v31 = vld [vmem:[%s5948_s7 + $0x298] sm:$0xff]  ;;  %v5181_v23 = vld [vmem:[%s5948_s7 + $0x2a0] sm:$0xff] }
  0x3a   :  { %5994 = vst [vmem:[#allocation50_spill] sm:$0xff] %v5171_v22  ;;  %5995 = vst [vmem:[#allocation51_spill] sm:$0xff] %v5176_v31  ;;  %v5186_v7 = vld [vmem:[%s5948_s7 + $0x2a8] sm:$0xff]  ;;  %v5191_v15 = vld [vmem:[%s5948_s7 + $0x2b0] sm:$0xff] }
  0x3b   :  { %5996 = vst [vmem:[#allocation52_spill] sm:$0xff] %v5181_v23  ;;  %5997 = vst [vmem:[#allocation53_spill] sm:$0xff] %v5186_v7  ;;  %v5196_v22 = vld [vmem:[%s5948_s7 + $0x2b8] sm:$0xff]  ;;  %v5201_v31 = vld [vmem:[%s5948_s7 + $0x2c0] sm:$0xff] }
  0x3c   :  { %5998 = vst [vmem:[#allocation54_spill] sm:$0xff] %v5191_v15  ;;  %5999 = vst [vmem:[#allocation55_spill] sm:$0xff] %v5196_v22  ;;  %v5206_v23 = vld [vmem:[%s5948_s7 + $0x2c8] sm:$0xff]  ;;  %v5211_v7 = vld [vmem:[%s5948_s7 + $0x2d0] sm:$0xff] }
  0x3d   :  { %6000 = vst [vmem:[#allocation56_spill] sm:$0xff] %v5201_v31  ;;  %6001 = vst [vmem:[#allocation57_spill] sm:$0xff] %v5206_v23  ;;  %v5216_v15 = vld [vmem:[%s5948_s7 + $0x2d8] sm:$0xff]  ;;  %v5221_v22 = vld [vmem:[%s5948_s7 + $0x2e0] sm:$0xff] }
  0x3e   :  { %6002 = vst [vmem:[#allocation58_spill] sm:$0xff] %v5211_v7  ;;  %6003 = vst [vmem:[#allocation59_spill] sm:$0xff] %v5216_v15  ;;  %v5226_v31 = vld [vmem:[%s5948_s7 + $0x2e8] sm:$0xff]  ;;  %v5231_v23 = vld [vmem:[%s5948_s7 + $0x2f0] sm:$0xff] }
  0x3f   :  { %6004 = vst [vmem:[#allocation60_spill] sm:$0xff] %v5221_v22  ;;  %6005 = vst [vmem:[#allocation61_spill] sm:$0xff] %v5226_v31  ;;  %v5236_v7 = vld [vmem:[%s5948_s7 + $0x2f8] sm:$0xff]  ;;  %v5241_v15 = vld [vmem:[%s5948_s7 + $0x300] sm:$0xff] }
  0x40   :  { %6006 = vst [vmem:[#allocation62_spill] sm:$0xff] %v5231_v23  ;;  %6007 = vst [vmem:[#allocation63_spill] sm:$0xff] %v5236_v7  ;;  %v5246_v22 = vld [vmem:[%s5948_s7 + $0x308] sm:$0xff]  ;;  %v5251_v31 = vld [vmem:[%s5948_s7 + $0x310] sm:$0xff] }
  0x41   :  { %6008 = vst [vmem:[#allocation64_spill] sm:$0xff] %v5241_v15  ;;  %6009 = vst [vmem:[#allocation65_spill] sm:$0xff] %v5246_v22  ;;  %v5256_v23 = vld [vmem:[%s5948_s7 + $0x318] sm:$0xff]  ;;  %v5261_v7 = vld [vmem:[%s5948_s7 + $0x320] sm:$0xff] }
  0x42   :  { %6010 = vst [vmem:[#allocation66_spill] sm:$0xff] %v5251_v31  ;;  %6011 = vst [vmem:[#allocation67_spill] sm:$0xff] %v5256_v23  ;;  %v5266_v15 = vld [vmem:[%s5948_s7 + $0x328] sm:$0xff]  ;;  %v5271_v22 = vld [vmem:[%s5948_s7 + $0x330] sm:$0xff] }
  0x43   :  { %6012 = vst [vmem:[#allocation68_spill] sm:$0xff] %v5261_v7  ;;  %6013 = vst [vmem:[#allocation69_spill] sm:$0xff] %v5266_v15  ;;  %v5276_v31 = vld [vmem:[%s5948_s7 + $0x338] sm:$0xff]  ;;  %v5281_v23 = vld [vmem:[%s5948_s7 + $0x340] sm:$0xff] }
  0x44   :  { %6014 = vst [vmem:[#allocation70_spill] sm:$0xff] %v5271_v22  ;;  %6015 = vst [vmem:[#allocation71_spill] sm:$0xff] %v5276_v31  ;;  %v5286_v7 = vld [vmem:[%s5948_s7 + $0x348] sm:$0xff]  ;;  %v5291_v15 = vld [vmem:[%s5948_s7 + $0x350] sm:$0xff] }
  0x45   :  { %6016 = vst [vmem:[#allocation72_spill] sm:$0xff] %v5281_v23  ;;  %6017 = vst [vmem:[#allocation73_spill] sm:$0xff] %v5286_v7  ;;  %v5296_v22 = vld [vmem:[%s5948_s7 + $0x358] sm:$0xff]  ;;  %v5301_v31 = vld [vmem:[%s5948_s7 + $0x360] sm:$0xff] }
  0x46   :  { %6018 = vst [vmem:[#allocation74_spill] sm:$0xff] %v5291_v15  ;;  %6019 = vst [vmem:[#allocation75_spill] sm:$0xff] %v5296_v22  ;;  %v5306_v23 = vld [vmem:[%s5948_s7 + $0x368] sm:$0xff]  ;;  %v5311_v7 = vld [vmem:[%s5948_s7 + $0x370] sm:$0xff] }
  0x47   :  { %6020 = vst [vmem:[#allocation76_spill] sm:$0xff] %v5301_v31  ;;  %6021 = vst [vmem:[#allocation77_spill] sm:$0xff] %v5306_v23  ;;  %v5316_v15 = vld [vmem:[%s5948_s7 + $0x378] sm:$0xff]  ;;  %v5321_v22 = vld [vmem:[%s5948_s7 + $0x380] sm:$0xff] }
  0x48   :  { %6022 = vst [vmem:[#allocation78_spill] sm:$0xff] %v5311_v7  ;;  %6023 = vst [vmem:[#allocation79_spill] sm:$0xff] %v5316_v15  ;;  %v5326_v31 = vld [vmem:[%s5948_s7 + $0x388] sm:$0xff]  ;;  %v5331_v23 = vld [vmem:[%s5948_s7 + $0x390] sm:$0xff] }
  0x49   :  { %6024 = vst [vmem:[#allocation80_spill] sm:$0xff] %v5321_v22  ;;  %6025 = vst [vmem:[#allocation81_spill] sm:$0xff] %v5326_v31  ;;  %v5336_v7 = vld [vmem:[%s5948_s7 + $0x398] sm:$0xff]  ;;  %v5341_v15 = vld [vmem:[%s5948_s7 + $0x3a0] sm:$0xff] }
  0x4a   :  { %6026 = vst [vmem:[#allocation82_spill] sm:$0xff] %v5331_v23  ;;  %6027 = vst [vmem:[#allocation83_spill] sm:$0xff] %v5336_v7  ;;  %v5346_v22 = vld [vmem:[%s5948_s7 + $0x3a8] sm:$0xff]  ;;  %v5351_v31 = vld [vmem:[%s5948_s7 + $0x3b0] sm:$0xff] }
  0x4b   :  { %6028 = vst [vmem:[#allocation84_spill] sm:$0xff] %v5341_v15  ;;  %6029 = vst [vmem:[#allocation85_spill] sm:$0xff] %v5346_v22  ;;  %v5356_v23 = vld [vmem:[%s5948_s7 + $0x3b8] sm:$0xff]  ;;  %v5361_v7 = vld [vmem:[%s5948_s7 + $0x3c0] sm:$0xff] }
  0x4c   :  { %6030 = vst [vmem:[#allocation86_spill] sm:$0xff] %v5351_v31  ;;  %6031 = vst [vmem:[#allocation87_spill] sm:$0xff] %v5356_v23  ;;  %v5366_v15 = vld [vmem:[%s5948_s7 + $0x3c8] sm:$0xff]  ;;  %v5371_v22 = vld [vmem:[%s5948_s7 + $0x3d0] sm:$0xff] }
  0x4d   :  { %6032 = vst [vmem:[#allocation88_spill] sm:$0xff] %v5361_v7  ;;  %6033 = vst [vmem:[#allocation89_spill] sm:$0xff] %v5366_v15  ;;  %v5376_v31 = vld [vmem:[%s5948_s7 + $0x3d8] sm:$0xff]  ;;  %v5381_v23 = vld [vmem:[%s5948_s7 + $0x3e0] sm:$0xff] }
  0x4e   :  { %6034 = vst [vmem:[#allocation90_spill] sm:$0xff] %v5371_v22  ;;  %6035 = vst [vmem:[#allocation91_spill] sm:$0xff] %v5376_v31  ;;  %v5386_v7 = vld [vmem:[%s5948_s7 + $0x3e8] sm:$0xff]  ;;  %v5391_v15 = vld [vmem:[%s5948_s7 + $0x3f0] sm:$0xff] }
  0x4f   :  { %6036 = vst [vmem:[#allocation92_spill] sm:$0xff] %v5381_v23  ;;  %6037 = vst [vmem:[#allocation93_spill] sm:$0xff] %v5386_v7  ;;  %v5396_v22 = vld [vmem:[%s5948_s7 + $0x3f8] sm:$0xff]  ;;  %v498_v31 = vld [vmem:[%s5941_s0] sm:$0xff] }
  0x50   :  { %6038 = vst [vmem:[#allocation94_spill] sm:$0xff] %v5391_v15  ;;  %6039 = vst [vmem:[#allocation95_spill] sm:$0xff] %v5396_v22  ;;  %v499_v23 = vld [vmem:[%s5941_s0 + $0x8] sm:$0xff]  ;;  %v500_v7 = vld [vmem:[%s5941_s0 + $0x10] sm:$0xff]  ;;  %529 = vrot.lane.b32.xlu0 %v498_v31, %s4601_s11  ;;  %v520_v15 = vrot.slane %v498_v31, 2 }
  0x51   :  { %v521_v6 = vrot.slane %v499_v23, 2  ;;  %v523_v30 = vrot.slane %v500_v7, 2  ;;  %v564_v22 = vld [vmem:[%s5942_s1] sm:$0xff] }
  0x52   :  { %497 = vsyncadd [#allocation4 + $0x1], 16384  ;;  %v507_v14 = vrot.slane %v498_v31, 6  ;;  %v501_v5 = vld [vmem:[%s5941_s0 + $0x18] sm:$0xff]  ;;  %v508_v29 = vrot.slane %v499_v23, 6  ;;  %s4602_s17 = smov 8  }
  0x53   :  { %v522_v21 = vsel %vm519_vm0, %v520_v15, %v521_v6  ;;  %v565_v13 = vld [vmem:[%s5942_s1 + $0x8] sm:$0xf]  ;;  %v512_v20 = vrot.slane %v501_v5, 6  ;;  %vm506_vm1 = vcmask 1041408   ;;  %vm586_vm2 = vcmask 1043456   ;;  %s4604_s30 = smov 16  }
  0x54   :  { %542 = vrot.lane.b32.xlu1 %v522_v21, %s4602_s17  ;;  %v4208_v4 = vpack.c.bf16 %v565_v13, %v564_v22  ;;  %531 = vrot.lane.b32.xlu0 %v499_v23, %s4601_s11  ;;  %v524_v15 = vsel %vm519_vm0, %v521_v6, %v523_v30  ;;  %v509_v31 = vsel %vm506_vm1, %v507_v14, %v508_v29  ;;  %v525_v28 = vrot.slane %v501_v5, 2  ;;  %s4606_s9 = smov 112   ;;  %s4610_s0 = smov 64  }
  0x55   :  { %vm4603_vm3 = vmmov 1   ;;  %v510_v12 = vrot.slane %v500_v7, 6  ;;  %vm554_vm5 = vcmask 31744   ;;  %v518_v22 = vsel %vm506_vm1, 0.0, %v507_v14  ;;  %s4611_s1 = smov 96   ;;  %s4612_s18 = smov 80  }
  0x56   :  { %vm4209_vm4 = vmpackc.low %vm586_vm2, %vm4603_vm3  ;;  %v526_v13 = vsel %vm519_vm0, %v523_v30, %v525_v28  ;;  %v528_v6 = vsel %vm519_vm0, %v525_v28, 0.0  ;;  %vm559_vm6 = vcmask 64512   ;;  %vm573_vm7 = vcmask 97280   ;;  %s4615_s24 = smov 88  }
  0x57   :  { %4210 = vmatprep.subr.msk.bf16.mxu0 %vm4209_vm4, %v4208_v4  ;;  %v511_v21 = vsel %vm506_vm1, %v508_v29, %v510_v12  ;;  %v513_v19 = vsel %vm506_vm1, %v510_v12, %v512_v20  ;;  %vm742_vm8 = vcmask 130048   ;;  %vm747_vm9 = vcmask 261120  }
  0x58   :  { %544 = vrot.lane.b32.xlu1 %v524_v15, %s4602_s17  ;;  %4213 = vmatpush3.bf16.msk.msra.mxu0 %vm4209_vm4, %v4208_v4  ;;  %vm761_vm10 = vcmask 392192   ;;  %vm4608_vm11 = vmmov 0   ;;  %vm896_vm12 = vcmask 523264   ;;  %vm898_vm13 = vcmask 785408  }
  0x59   :  { %533 = vrot.lane.b32.xlu0 %v500_v7, %s4601_s11  ;;  %vm1151_vm14 = vcmask 9216   ;;  %vm1165_vm15 = vcmask 15360  }
  0x5c   :  { %535 = vrot.lane.b32.xlu1 %v501_v5, %s4601_s11 }
  0x5d   :  { %546 = vrot.lane.b32.xlu0 %v526_v13, %s4602_s17 }
  0x60   :  { %548 = vrot.lane.b32.xlu1 %v528_v6, %s4602_s17 }
  0xc2   :  { %v530_v4 = vpop.permute.xlu0 %529 }
  0xc3   :  { %v555_v23 = vsel %vm554_vm5, %v518_v22, %v530_v4 }
  0xc6   :  { %v543_v12 = vpop.permute.xlu1 %542  ;;  %v532_v7 = vpop.permute.xlu0 %531 }
  0xc7   :  { %v560_v20 = vsel %vm559_vm6, %v555_v23, %v543_v12  ;;  %v556_v5 = vsel %vm554_vm5, %v509_v31, %v532_v7  ;;  %v5448_v23 = vld [vmem:[%s5946_s5 + $0x10] ss:$0 sm:$0xff]  ;;  %v753_v12 = vld [vmem:[%s5943_s2 + $0x8] sm:$0xff] }
  0xc8   :  { %4088 = vmatprep.mubr.msk.f32.mxu0 %vm573_vm7, %v560_v20 }
  0xca   :  { %v545_v29 = vpop.permute.xlu1 %544 }
  0xcb   :  { %v561_v28 = vsel %vm559_vm6, %v556_v5, %v545_v29  ;;  %v534_v30 = vpop.permute.xlu0 %533 }
  0xcc   :  { %4089 = vmatmul.mubr.msk.f32.vlgmr.msra.gmra.mrb[0].mxu0 %vm573_vm7, %v561_v28  ;;  %v557_v14 = vsel %vm554_vm5, %v511_v21, %v534_v30  ;;  %v752_v21 = vld [vmem:[%s5943_s2] sm:$0xff]  ;;  %v754_v30 = vld [vmem:[%s5943_s2 + $0x10] sm:$0xff] }
  0xcd   :  { %v4214_v7 = vpack.c.bf16 %v753_v12, %v752_v21 }
  0xce   :  { %v536_v15 = vpop.permute.xlu1 %535 }
  0xcf   :  { %v547_v13 = vpop.permute.xlu0 %546  ;;  %v558_v22 = vsel %vm554_vm5, %v513_v19, %v536_v15  ;;  %4215 = vmatprep.subr.bf16.mxu1 %v4214_v7 }
  0xd0   :  { %v562_v6 = vsel %vm559_vm6, %v557_v14, %v547_v13  ;;  %4217 = vmatpush3.bf16.msra.mxu1 %v4214_v7  ;;  %v755_v14 = vld [vmem:[%s5943_s2 + $0x18] sm:$0xff] }
  0xd1   :  { %4091 = vmatprep.mubr.msk.f32.mxu0 %vm573_vm7, %v562_v6  ;;  %v4218_v13 = vpack.c.bf16 %v755_v14, %v754_v30 }
  0xd2   :  { %v549_v4 = vpop.permute.xlu1 %548 }
  0xd3   :  { %v563_v31 = vsel %vm559_vm6, %v558_v22, %v549_v4  ;;  %4219 = vmatprep.subr.bf16.mxu1 %v4218_v13  ;;  %v756_v4 = vld [vmem:[%s5943_s2 + $0x20] sm:$0xff] }
  0xd4   :  { %4092 = vmatmul.mubr.msk.f32.gmra.mrb[2].mxu0 %vm573_vm7, %v563_v31  ;;  %4221 = vmatpush3.bf16.msra.mxu1 %v4218_v13  ;;  %v757_v31 = vld [vmem:[%s5943_s2 + $0x28] sm:$0xff]  ;;  %s4605_s2 = smov 32  }
  0xd5   :  { %v4222_v7 = vpack.c.bf16 %v757_v31, %v756_v4 }
  0xd7   :  { %4223 = vmatprep.subr.bf16.mxu1 %v4222_v7 }
  0xd8   :  { %4225 = vmatpush3.bf16.msra.mxu1 %v4222_v7 }
 0x19f   :  { %v4090_v19 = vpop.f32.mrb[0].mxu0 }
 0x1a0   :  { %v662_v20 = vadd.f32 %v4090_v19, %v5448_v23  ;;  %v656_v5 = vpop.f32.mrb[1].mxu0 }
 0x1a1   :  { %v657_v29 = vadd.f32 %v5448_v23, %v656_v5 }
 0x1a2   :  { %v676_v28 = vmax.f32 %v662_v20, 0.0 }
 0x1a3   :  { %v675_v15 = vmax.f32 %v657_v29, 0.0 }
 0x1a4   :  { %v684_v6 = vrot.slane %v676_v28, 2 }
 0x1a5   :  { %v683_v22 = vrot.slane %v675_v15, 2 }
 0x1a7   :  { %v685_v21 = vsel %vm519_vm0, %v683_v22, %v684_v6  ;;  %v4093_v12 = vpop.f32.mrb[2].mxu0 }
 0x1a8   :  { %v695_v19 = vmax.f32 %v675_v15, %v685_v21  ;;  %v672_v20 = vadd.f32 %v4093_v12, %v5448_v23  ;;  %v666_v5 = vpop.f32.mrb[3].mxu0 }
 0x1a9   :  { %v667_v29 = vadd.f32 %v5448_v23, %v666_v5 }
 0x1aa   :  { %v678_v30 = vmax.f32 %v672_v20, 0.0  ;;  %717 = vrot.lane.b32.xlu0 %v695_v19, %s4604_s30  ;;  %v703_v20 = vrot.slane %v695_v19, 4 }
 0x1ab   :  { %v677_v14 = vmax.f32 %v667_v29, 0.0 }
 0x1ac   :  { %v688_v13 = vrot.slane %v678_v30, 2 }
 0x1ad   :  { %v686_v3 = vrot.slane %v677_v14, 2 }
 0x1ae   :  { %v694_v27 = vsel %vm519_vm0, %v688_v13, 0.0 }
 0x1af   :  { %v698_v22 = vmax.f32 %v678_v30, %v694_v27  ;;  %v689_v4 = vsel %vm519_vm0, %v686_v3, %v688_v13  ;;  %v687_v15 = vsel %vm519_vm0, %v684_v6, %v686_v3  ;;  %v714_v30 = vsel %vm586_vm2, 0.0, %v703_v20 }
 0x1b0   :  { %v697_v31 = vmax.f32 %v677_v14, %v689_v4  ;;  %v696_v21 = vmax.f32 %v676_v28, %v687_v15  ;;  %vm1841_vm0 = vcmask 125952  }
 0x1b1   :  { %v708_v12 = vrot.slane %v698_v22, 4  ;;  %723 = vrot.lane.b32.xlu1 %v698_v22, %s4604_s30 }
 0x1b2   :  { %v706_v5 = vrot.slane %v697_v31, 4  ;;  %721 = vrot.lane.b32.xlu0 %v697_v31, %s4604_s30  ;;  %v704_v7 = vrot.slane %v696_v21, 4 }
 0x1b3   :  { %v716_v3 = vsel %vm586_vm2, %v708_v12, 0.0 }
 0x1b4   :  { %v705_v29 = vsel %vm586_vm2, %v703_v20, %v704_v7  ;;  %v707_v11 = vsel %vm586_vm2, %v704_v7, %v706_v5  ;;  %v709_v27 = vsel %vm586_vm2, %v706_v5, %v708_v12 }
 0x1b5   :  { %719 = vrot.lane.b32.xlu1 %v696_v21, %s4604_s30 }
 0x1b6   :  { %730 = vrot.lane.b32.xlu0 %v705_v29, %s4605_s2 }
 0x1b9   :  { %732 = vrot.lane.b32.xlu1 %v707_v11, %s4605_s2 }
 0x1ba   :  { %734 = vrot.lane.b32.xlu0 %v709_v27, %s4605_s2 }
 0x1bd   :  { %736 = vrot.lane.b32.xlu1 %v716_v3, %s4605_s2 }
 0x1be   :  { %758 = vrot.lane.b32.xlu0 %v5448_v23, %s4606_s9 }
 0x21c   :  { %v718_v28 = vpop.permute.xlu0 %717 }
 0x21d   :  { %v743_v13 = vsel %vm742_vm8, %v714_v30, %v718_v28  ;;  %v5950_v30 = vmov 0.0|0.0  }
 0x21e   :  { %4226 = vmatprep.subr.bf16.mxu0 %v5950_v30  ;;  %4250 = vmatprep.subr.bf16.mxu1 %v5950_v30 }
 0x223   :  { %v724_v6 = vpop.permute.xlu1 %723 }
 0x224   :  { %v722_v19 = vpop.permute.xlu0 %721  ;;  %v746_v20 = vsel %vm742_vm8, %v709_v27, %v724_v6  ;;  %v903_v6 = vld [vmem:[%s5944_s3 + $0x18] sm:$0xff] }
 0x225   :  { %v745_v21 = vsel %vm742_vm8, %v707_v11, %v722_v19  ;;  %v900_v11 = vld [vmem:[%s5944_s3] sm:$0xff]  ;;  %v902_v19 = vld [vmem:[%s5944_s3 + $0x10] sm:$0xff] }
 0x227   :  { %v720_v14 = vpop.permute.xlu1 %719 }
 0x228   :  { %v731_v22 = vpop.permute.xlu0 %730  ;;  %v744_v15 = vsel %vm742_vm8, %v705_v29, %v720_v14  ;;  %v901_v29 = vld [vmem:[%s5944_s3 + $0x8] sm:$0xff]  ;;  %v4230_v14 = vpack.c.bf16 %v903_v6, %v902_v19 }
 0x229   :  { %v748_v4 = vsel %vm747_vm9, %v743_v13, %v731_v22  ;;  %v4227_v27 = vpack.c.bf16 %v901_v29, %v900_v11  ;;  %v904_v13 = vld [vmem:[%s5944_s3 + $0x20] sm:$0xff]  ;;  %v905_v22 = vld [vmem:[%s5944_s3 + $0x28] sm:$0xff] }
 0x22a   :  { %4106 = vmatprep.mubr.msk.f32.mxu1 %vm761_vm10, %v748_v4  ;;  %v4233_v4 = vpack.c.bf16 %v905_v22, %v904_v13  ;;  %v912_v11 = vld [vmem:[%s5944_s3 + $0x60] sm:$0xff]  ;;  %v913_v29 = vld [vmem:[%s5944_s3 + $0x68] sm:$0xff]  ;;  %v914_v22 = vld [vmem:[%s5944_s3 + $0x70] sm:$0xff] }
 0x22b   :  { %v733_v31 = vpop.permute.xlu1 %732  ;;  %4228 = vmatpush3.bf16.msra.mxu0 %v4227_v27  ;;  %v4245_v19 = vpack.c.bf16 %v913_v29, %v912_v11  ;;  %v5951_v29 = vmov 0.0  }
 0x22c   :  { %v749_v12 = vsel %vm747_vm9, %v744_v15, %v733_v31  ;;  %v735_v5 = vpop.permute.xlu0 %734  ;;  %4229 = vmatprep.subr.bf16.mxu0 %v5950_v30  ;;  %v906_v15 = vld [vmem:[%s5944_s3 + $0x30] sm:$0xff]  ;;  %v907_v31 = vld [vmem:[%s5944_s3 + $0x38] sm:$0xff]  ;;  %4144 = vmatprep.mubr.msk.f32.mxu0 %vm4608_vm11, %v5951_v29 }
 0x22d   :  { %v750_v7 = vsel %vm747_vm9, %v745_v21, %v735_v5  ;;  %4107 = vmatmul.mubr.msk.f32.vlgmr.msra.gmra.mrb[0].mxu1 %vm761_vm10, %v749_v12  ;;  %v4236_v21 = vpack.c.bf16 %v907_v31, %v906_v15  ;;  %v908_v12 = vld [vmem:[%s5944_s3 + $0x40] sm:$0xff]  ;;  %v909_v5 = vld [vmem:[%s5944_s3 + $0x48] sm:$0xff] }
 0x22e   :  { %4109 = vmatprep.mubr.msk.f32.mxu1 %vm761_vm10, %v750_v7  ;;  %v4239_v7 = vpack.c.bf16 %v909_v5, %v908_v12 }
 0x22f   :  { %v737_v3 = vpop.permute.xlu1 %736  ;;  %4231 = vmatpush3.bf16.msra.mxu0 %v4230_v14 }
 0x230   :  { %v751_v28 = vsel %vm747_vm9, %v746_v20, %v737_v3  ;;  %4232 = vmatprep.subr.bf16.mxu0 %v5950_v30  ;;  %v910_v20 = vld [vmem:[%s5944_s3 + $0x50] sm:$0xff]  ;;  %v911_v3 = vld [vmem:[%s5944_s3 + $0x58] sm:$0xff]  ;;  %v759_v27 = vpop.permute.xlu0 %758 }
 0x231   :  { %4110 = vmatmul.mubr.msk.f32.gmra.mrb[2].mxu1 %vm761_vm10, %v751_v28  ;;  %v4242_v28 = vpack.c.bf16 %v911_v3, %v910_v20 }
 0x232   :  { %4151 = vmatprep.mubr.msk.f32.mxu1 %vm4608_vm11, %v5951_v29 }
 0x233   :  { %4234 = vmatpush3.bf16.msra.mxu0 %v4233_v4  ;;  %v915_v4 = vld [vmem:[%s5944_s3 + $0x78] sm:$0xff] }
 0x234   :  { %4235 = vmatprep.subr.bf16.mxu0 %v5950_v30  ;;  %v4248_v31 = vpack.c.bf16 %v915_v4, %v914_v22 }
 0x237   :  { %4237 = vmatpush3.bf16.msra.mxu0 %v4236_v21 }
 0x238   :  { %4238 = vmatprep.subr.bf16.mxu0 %v5950_v30 }
 0x23b   :  { %4240 = vmatpush3.bf16.msra.mxu0 %v4239_v7 }
 0x23c   :  { %4241 = vmatprep.subr.bf16.mxu0 %v5950_v30 }
 0x23f   :  { %4243 = vmatpush3.bf16.msra.mxu0 %v4242_v28 }
 0x240   :  { %4244 = vmatprep.subr.bf16.mxu0 %v5950_v30 }
 0x243   :  { %4246 = vmatpush3.bf16.msra.mxu0 %v4245_v19 }
 0x244   :  { %4247 = vmatprep.subr.bf16.mxu0 %v5950_v30 }
 0x247   :  { %4249 = vmatpush3.bf16.msra.mxu0 %v4248_v31 }
 0x248   :  { %4174 = vmatprep.subr.mxu0 %v5951_v29 }
 0x300   :  { %v4108_v6 = vpop.f32.mrb[0].mxu1 }
 0x301   :  { %v846_v14 = vadd.f32 %v4108_v6, %v759_v27  ;;  %v840_v13 = vpop.f32.mrb[1].mxu1 }
 0x302   :  { %v841_v15 = vadd.f32 %v840_v13, %v759_v27 }
 0x303   :  { %v860_v21 = vmax.f32 %v846_v14, 0.0 }
 0x304   :  { %v859_v12 = vmax.f32 %v841_v15, 0.0  ;;  %v4111_v5 = vpop.f32.mrb[2].mxu1 }
 0x305   :  { %v868_v7 = vrot.slane %v860_v21, 4  ;;  %v856_v20 = vadd.f32 %v4111_v5, %v759_v27  ;;  %v850_v3 = vpop.f32.mrb[3].mxu1 }
 0x306   :  { %v867_v28 = vrot.slane %v859_v12, 4  ;;  %v851_v11 = vadd.f32 %v850_v3, %v759_v27 }
 0x307   :  { %v862_v19 = vmax.f32 %v856_v20, 0.0 }
 0x308   :  { %v869_v6 = vsel %vm586_vm2, %v867_v28, %v868_v7  ;;  %v861_v14 = vmax.f32 %v851_v11, 0.0 }
 0x309   :  { %v879_v13 = vmax.f32 %v859_v12, %v869_v6  ;;  %v872_v22 = vrot.slane %v862_v19, 4 }
 0x30a   :  { %v870_v4 = vrot.slane %v861_v14, 4 }
 0x30b   :  { %v878_v3 = vsel %vm586_vm2, %v872_v22, 0.0 }
 0x30c   :  { %v873_v15 = vsel %vm586_vm2, %v870_v4, %v872_v22  ;;  %v871_v27 = vsel %vm586_vm2, %v868_v7, %v870_v4  ;;  %v882_v20 = vmax.f32 %v862_v19, %v878_v3  ;;  %v5582_v19 = vld [vmem:[%s5945_s4] sm:$0xff] }
 0x30d   :  { %v881_v31 = vmax.f32 %v861_v14, %v873_v15  ;;  %v880_v5 = vmax.f32 %v860_v21, %v871_v27  ;;  %v5587_v14 = vld [vmem:[%s5945_s4 + $0x8] sm:$0xff]  ;;  %s4614_s4 = smov 120  }
 0x30f   :  { %888 = vrot.lane.b32.xlu0 %v881_v31, %s4610_s0  ;;  %884 = vrot.lane.b32.xlu1 %v880_v5, %s4605_s2  ;;  %v916_v31 = vld [vmem:[%s5944_s3 + $0x80] sm:$0xf]  ;;  %s4613_s3 = smov 104  }
 0x313   :  { %892 = vrot.lane.b32.xlu1 %v882_v20, %s4611_s1  ;;  %917 = vrot.lane.b32.xlu0 %v5448_v23, %s4612_s18 }
 0x317   :  { %997 = vrot.lane.b32.xlu1 %v5448_v23, %s4610_s0 }
 0x381   :  { %v885_v12 = vpop.permute.xlu1 %884  ;;  %v889_v21 = vpop.permute.xlu0 %888 }
 0x382   :  { %v895_v7 = vsel %vm747_vm9, %v879_v13, %v885_v12  ;;  %v4251_v13 = vpack.c.bf16 %v5587_v14, %v5582_v19 }
 0x383   :  { %v897_v11 = vsel %vm896_vm12, %v895_v7, %v889_v21 }
 0x384   :  { %4252 = vmatpush3.bf16.msra.mxu1 %v4251_v13 }
 0x385   :  { %v893_v28 = vpop.permute.xlu1 %892  ;;  %4154 = vmatprep.subr.mxu1 %v5951_v29  ;;  %v918_v22 = vpop.permute.xlu0 %917 }
 0x386   :  { %v899_v6 = vsel %vm898_vm13, %v897_v11, %v893_v28 }
 0x387   :  { %4145 = vmatmul.mubr.f32.vlgmr.msra.gmra.mrb[4].mxu0 %v899_v6 }
 0x388   :  { %4176 = vmatprep.mubr.msk.f32.mxu0 %vm4608_vm11, %v5951_v29 }
 0x389   :  { %v998_v12 = vpop.permute.xlu1 %997 }
 0x45a   :  { %v986_v4 = vpop.f32.mrb[4].mxu0 }
 0x45b   :  { %v987_v15 = vadd.f32 %v986_v4, %v918_v22  ;;  %v4146_v27 = vpop.f32.mrb[5].mxu0 }
 0x45d   :  { %v991_v5 = vrot.slane %v987_v15, 6 }
 0x45f   :  { %v993_v3 = vsel %vm506_vm1, %v987_v15, %v991_v5 }
 0x460   :  { %v5596_v20 = vadd.f32 %v993_v3, %v916_v31 }
 0x462   :  { %4152 = vmatmul.mubr.msk.f32.vlgmr.msra.gmra.mrb[4].mxu1 %vm742_vm8, %v5596_v20 }
 0x463   :  { %4156 = vmatprep.mubr.msk.f32.mxu1 %vm4608_vm11, %v5951_v29 }
 0x535   :  { %v1069_v21 = vpop.f32.mrb[4].mxu1 }
 0x536   :  { %v5602_v7 = vadd.f32 %v1069_v21, %v998_v12  ;;  %v4153_v28 = vpop.f32.mrb[5].mxu1 }
 0x538   :  { %1074 = vrot.lane.b32.xlu0 %v5602_v7, %s4606_s9  ;;  %v5616_v15 = vrot.slane %v5602_v7, 2 }
 0x5aa   :  { %v1075_v11 = vpop.permute.xlu0 %1074 }
 0x5ab   :  { %4155 = vmatpush3.xpose.msk.msra.mxu1 %vm559_vm6, %v1075_v11 }
 0x5ac   :  { %4159 = vmatprep.subr.mxu1 %v5951_v29 }
 0x5ae   :  { %4157 = vmatmul.mubr.msk.f32.vlgmr.msra.gmra.mrb[6].mxu1 %vm559_vm6, %v5602_v7 }
 0x5af   :  { %4161 = vmatprep.mubr.msk.f32.mxu1 %vm4608_vm11, %v5951_v29 }
 0x681   :  { %v1146_v6 = vpop.f32.mrb[6].mxu1 }
 0x682   :  { %v1150_v13 = vmul.f32 0.35355338, %v1146_v6  ;;  %v4158_v22 = vpop.f32.mrb[7].mxu1 }
 0x684   :  { %v1152_v4 = vsel %vm1151_vm14, %v1150_v13, -inf }
 0x685   :  { %1153 = vmax.xlane.f32.xlu1 %v1152_v4 }
 0x696   :  { %1243 = vrot.lane.b32.xlu1 %v5602_v7, %s4613_s3 }
 0x69a   :  { %1241 = vrot.lane.b32.xlu1 %v5602_v7, %s4614_s4 }
 0x69e   :  { %1581 = vrot.lane.b32.xlu1 %v5616_v15, %s4613_s3 }
 0x712   :  { %v1154_v27 = vpop.xlane.xlu1 %1153 }
 0x713   :  { %v1155_v31 = vsub.f32 %v1150_v13, %v1154_v27 }
 0x715   :  { %v1156_v5 = vmul.f32 1.442695, %v1155_v31 }
 0x716   :  { %v1244_v21 = vpop.permute.xlu1 %1243 }
 0x717   :  { %4568 = vpow2.f32 %v1156_v5 }
 0x71a   :  { %v1242_v6 = vpop.permute.xlu1 %1241 }
 0x71e   :  { %v1582_v4 = vpop.permute.xlu1 %1581 }
 0x721   :  { %v4569_v3 = vpop.eup %4568 }
 0x722   :  { %v1158_v12 = vsel %vm1151_vm14, %v4569_v3, 0.0 }
 0x723   :  { %1159 = vadd.xlane.f32.xlu0 %v1158_v12 }
 0x739   :  { %1163 = vrot.lane.b32.xlu0 %v5602_v7, %s4611_s1 }
 0x73d   :  { %1414 = vrot.lane.b32.xlu0 %v5616_v15, %s4606_s9 }
 0x741   :  { %1579 = vrot.lane.b32.xlu0 %v5616_v15, %s4614_s4 }
 0x7b0   :  { %v1160_v28 = vpop.xlane.xlu0 %1159 }
 0x7b1   :  { %4570 = vrcp.f32 %v1160_v28 }
 0x7b4   :  { %v1164_v11 = vpop.permute.xlu0 %1163 }
 0x7b5   :  { %4160 = vmatpush3.msk.msra.mxu1 %vm506_vm1, %v1164_v11 }
 0x7b6   :  { %4164 = vmatprep.subr.mxu1 %v5951_v29 }
 0x7b8   :  { %v1415_v13 = vpop.permute.xlu0 %1414 }
 0x7b9   :  { %4175 = vmatpush3.xpose.msk.msra.mxu0 %vm559_vm6, %v1415_v13 }
 0x7ba   :  { %4184 = vmatprep.subr.mxu0 %v5951_v29 }
 0x7bb   :  { %v4571_v22 = vpop.eup %4570 }
 0x7bc   :  { %v1162_v27 = vmul.f32 %v4571_v22, %v4569_v3  ;;  %4177 = vmatmul.mubr.msk.f32.vlgmr.msra.gmra.mrb[6].mxu0 %vm559_vm6, %v5616_v15  ;;  %v1580_v31 = vpop.permute.xlu0 %1579 }
 0x7bd   :  { %4185 = vmatpush3.xpose.msk.msra.mxu0 %vm559_vm6, %v1582_v4  ;;  %4186 = vmatprep.mubr.msk.f32.mxu0 %vm4608_vm11, %v5951_v29 }
 0x7be   :  { %4162 = vmatmul.mubr.msk.f32.vlgmr.msra.gmra.mrb[8].mxu1 %vm1165_vm15, %v1162_v27  ;;  %4253 = vmatprep.subr.bf16.mxu0 %v5950_v30 }
 0x7bf   :  { %4165 = vmatpush3.xpose.msk.msra.mxu1 %vm559_vm6, %v1244_v21  ;;  %4166 = vmatprep.mubr.msk.f32.mxu1 %vm4608_vm11, %v5951_v29 }
 0x7c0   :  { %4187 = vmatmul.mubr.msk.f32.vlgmr.msra.gmra.mrb[8].mxu0 %vm559_vm6, %v1580_v31  ;;  %4169 = vmatprep.subr.mxu1 %v5951_v29 }
 0x7c1   :  { %4198 = vmatprep.mubr.msk.f32.mxu0 %vm4608_vm11, %v5951_v29 }
 0x7c2   :  { %4167 = vmatmul.mubr.msk.f32.vlgmr.msra.gmra.mrb[10].mxu1 %vm559_vm6, %v1242_v6 }
 0x7c3   :  { %4171 = vmatprep.mubr.msk.f32.mxu1 %vm4608_vm11, %v5951_v29 }
 0x88f   :  { %v1486_v5 = vpop.f32.mrb[6].mxu0 }
 0x890   :  { %v1490_v3 = vmul.f32 0.35355338, %v1486_v5  ;;  %v4178_v12 = vpop.f32.mrb[7].mxu0 }
 0x891   :  { %v5646_v28 = vpop.f32.mrb[8].mxu1 }
 0x892   :  { %v4163_v21 = vpop.f32.mrb[9].mxu1  ;;  %v1491_v11 = vsel %vm1151_vm14, %v1490_v3, -inf }
 0x893   :  { %1492 = vmax.xlane.f32.xlu0 %v1491_v11  ;;  %v1653_v13 = vpop.f32.mrb[8].mxu0 }
 0x894   :  { %v1657_v22 = vmul.f32 0.35355338, %v1653_v13  ;;  %v4188_v4 = vpop.f32.mrb[9].mxu0 }
 0x895   :  { %v1315_v27 = vpop.f32.mrb[10].mxu1 }
 0x896   :  { %v1319_v31 = vmul.f32 0.35355338, %v1315_v27  ;;  %v4168_v30 = vpop.f32.mrb[11].mxu1  ;;  %v1658_v6 = vsel %vm1151_vm14, %v1657_v22, -inf }
 0x897   :  { %1659 = vmax.xlane.f32.xlu0 %v1658_v6 }
 0x898   :  { %v1320_v29 = vsel %vm1151_vm14, %v1319_v31, -inf }
 0x899   :  { %1321 = vmax.xlane.f32.xlu1 %v1320_v29 }
 0x920   :  { %v1493_v5 = vpop.xlane.xlu0 %1492 }
 0x921   :  { %v1494_v12 = vsub.f32 %v1490_v3, %v1493_v5 }
 0x923   :  { %v1495_v18 = vmul.f32 1.442695, %v1494_v12 }
 0x924   :  { %v1660_v2 = vpop.xlane.xlu0 %1659 }
 0x925   :  { %4572 = vpow2.f32 %v1495_v18  ;;  %v1661_v21 = vsub.f32 %v1657_v22, %v1660_v2  ;;  %v5660_v22 = vpack.i.bf16 %v5587_v14, %v5582_v19 }
 0x926   :  { %v1322_v29 = vpop.xlane.xlu1 %1321 }
 0x927   :  { %v1662_v26 = vmul.f32 1.442695, %v1661_v21  ;;  %v1323_v3 = vsub.f32 %v1319_v31, %v1322_v29 }
 0x929   :  { %4574 = vpow2.f32 %v1662_v26  ;;  %v1324_v18 = vmul.f32 1.442695, %v1323_v3 }
 0x92b   :  { %4576 = vpow2.f32 %v1324_v18 }
 0x92f   :  { %v4573_v11 = vpop.eup %4572 }
 0x930   :  { %v1497_v13 = vsel %vm1151_vm14, %v4573_v11, 0.0 }
 0x931   :  { %1498 = vadd.xlane.f32.xlu0 %v1497_v13 }
 0x933   :  { %v4575_v4 = vpop.eup %4574 }
 0x934   :  { %v1664_v30 = vsel %vm1151_vm14, %v4575_v4, 0.0 }
 0x935   :  { %1665 = vadd.xlane.f32.xlu1 %v1664_v30  ;;  %v4577_v2 = vpop.eup %4576 }
 0x936   :  { %v1326_v26 = vsel %vm1151_vm14, %v4577_v2, 0.0 }
 0x946   :  { %1502 = vrot.lane.b32.xlu1 %v5616_v15, %s4611_s1 }
 0x947   :  { %1331 = vrot.lane.b32.xlu0 %v5602_v7, %s4615_s24  ;;  %v6040_v7 = vmov 0.0  }
 0x94b   :  { %4564 = vrot.lane.b32.xlu0 %v5660_v22, %s4612_s18 }
 0x96a   :  { %1327 = vadd.xlane.f32.xlu1 %v1326_v26 }
 0x97b   :  { %1669 = vrot.lane.b32.xlu1 %v5616_v15, %s4615_s24 }
 0x9be   :  { %v1499_v27 = vpop.xlane.xlu0 %1498 }
 0x9c2   :  { %v1332_v6 = vpop.permute.xlu0 %1331  ;;  %v1666_v31 = vpop.xlane.xlu1 %1665 }
 0x9c3   :  { %4170 = vmatpush3.msk.msra.mxu1 %vm506_vm1, %v1332_v6 }
 0x9c4   :  { %4179 = vmatprep.subr.mxu1 %v6040_v7 }
 0x9c6   :  { %v1503_v5 = vpop.permute.xlu1 %1502  ;;  %v4565_v3 = vpop.permute.xlu0 %4564 }
 0x9c7   :  { %v4567_v18 = vunpack.i.h.bf16 %v4565_v3 }
 0x9f7   :  { %v1328_v12 = vpop.xlane.xlu1 %1327 }
 0x9f8   :  { %4578 = vrcp.f32 %v1328_v12 }
 0x9f9   :  { %4580 = vrcp.f32 %v1499_v27 }
 0x9fa   :  { %4582 = vrcp.f32 %v1666_v31 }
 0x9fb   :  { %v1670_v30 = vpop.permute.xlu1 %1669 }
 0xa02   :  { %v4579_v15 = vpop.eup %4578 }
 0xa03   :  { %v1330_v21 = vmul.f32 %v4579_v15, %v4577_v2  ;;  %v4581_v13 = vpop.eup %4580  ;;  %v4566_v2 = vunpack.i.l.bf16 %v4565_v3 }
 0xa04   :  { %v1501_v19 = vmul.f32 %v4581_v13, %v4573_v11  ;;  %v4583_v14 = vpop.eup %4582 }
 0xa05   :  { %4172 = vmatmul.mubr.msk.f32.vlgmr.msra.gmra.mrb[12].mxu1 %vm1165_vm15, %v1330_v21  ;;  %v1668_v29 = vmul.f32 %v4583_v14, %v4575_v4  ;;  %v4254_v26 = vpack.c.bf16 %v4567_v18, %v4566_v2 }
 0xa06   :  { %4180 = vmatpush3.msk.msra.mxu1 %vm506_vm1, %v1503_v5  ;;  %4181 = vmatprep.mubr.msk.f32.mxu1 %vm4608_vm11, %v6040_v7 }
 0xa07   :  { %4189 = vmatprep.subr.mxu1 %v6040_v7  ;;  %4255 = vmatpush3.bf16.msra.mxu0 %v4254_v26  ;;  %v3733_v26 = vld [vmem:[%s5946_s5 + $0x11] ss:$0 sm:$0xff] }
 0xa09   :  { %4182 = vmatmul.mubr.msk.f32.vlgmr.msra.gmra.mrb[14].mxu1 %vm1165_vm15, %v1501_v19 }
 0xa0a   :  { %4190 = vmatpush3.msk.msra.mxu1 %vm506_vm1, %v1670_v30  ;;  %4191 = vmatprep.mubr.msk.f32.mxu1 %vm4608_vm11, %v6040_v7 }
 0xa0d   :  { %4192 = vmatmul.mubr.msk.f32.vlgmr.msra.gmra.mrb[16].mxu1 %vm1165_vm15, %v1668_v29 }
 0xad8   :  { %v1404_v11 = vpop.f32.mrb[12].mxu1 }
 0xad9   :  { %1409 = vrot.lane.b32.xlu0 %v1404_v11, %s4602_s17  ;;  %v4173_v27 = vpop.f32.mrb[13].mxu1 }
 0xadc   :  { %v1575_v6 = vpop.f32.mrb[14].mxu1 }
 0xadd   :  { %v4183_v31 = vpop.f32.mrb[15].mxu1 }
 0xae0   :  { %v1742_v5 = vpop.f32.mrb[16].mxu1 }
 0xae1   :  { %1747 = vrot.lane.b32.xlu1 %v1742_v5, %s4602_s17  ;;  %v4193_v12 = vpop.f32.mrb[17].mxu1 }
 0xae5   :  { %1763 = vrot.lane.b32.xlu1 %v5448_v23, %s4604_s30 }
 0xb4b   :  { %v1410_v4 = vpop.permute.xlu0 %1409 }
 0xb4c   :  { %v1412_v19 = vsel %vm559_vm6, %v5646_v28, %v1410_v4 }
 0xb53   :  { %v1748_v15 = vpop.permute.xlu1 %1747 }
 0xb54   :  { %v1750_v21 = vsel %vm559_vm6, %v1575_v6, %v1748_v15 }
 0xb55   :  { %v1752_v13 = vrot.slane %v1750_v21, 6 }
 0xb57   :  { %v1754_v14 = vsel %vm506_vm1, %v1412_v19, %v1752_v13  ;;  %v1764_v30 = vpop.permute.xlu1 %1763 }
 0xb58   :  { %4199 = vmatmul.mubr.msk.f32.vlgmr.msra.gmra.mrb[10].mxu0 %vm742_vm8, %v1754_v14 }
 0xc2b   :  { %v1835_v29 = vpop.f32.mrb[10].mxu0 }
 0xc2c   :  { %v1836_v3 = vadd.f32 %v1835_v29, %v1764_v30  ;;  %v4200_v18 = vpop.f32.mrb[11].mxu0 }
 0xc2e   :  { %v1839_v2 = vadd.f32 %v1836_v3, %v5596_v20 }
 0xc30   :  { %v1842_v23 = vsel %vm1841_vm0, %v1839_v2, 0.0 }
 0xc31   :  { %1843 = vadd.xlane.f32.xlu0 %v1842_v23 }
 0xc47   :  { %1863 = vrot.lane.b32.xlu0 %v3733_v26, %s4606_s9 }
 0xcbe   :  { %v1844_v28 = vpop.xlane.xlu0 %1843 }
 0xcbf   :  { %v1846_v11 = vmul.f32 0.0625, %v1844_v28 }
 0xcc1   :  { %v1847_v27 = vsub.f32 %v1839_v2, %v1846_v11 }
 0xcc2   :  { %v1864_v21 = vpop.permute.xlu0 %1863 }
 0xcc3   :  { %v1848_v6 = vmul.f32 %v1847_v27, %v1847_v27 }
 0xcc5   :  { %v1849_v31 = vsel %vm1841_vm0, %v1848_v6, 0.0 }
 0xcc6   :  { %1850 = vadd.xlane.f32.xlu1 %v1849_v31 }
 0xd53   :  { %v1851_v5 = vpop.xlane.xlu1 %1850 }
 0xd54   :  { %v1852_v12 = vmul.f32 0.0625, %v1851_v5 }
 0xd56   :  { %v1853_v4 = vadd.f32 1e-05, %v1852_v12 }
 0xd58   :  { %4584 = vrsqrt.f32 %v1853_v4 }
 0xd62   :  { %v4585_v20 = vpop.eup %4584 }
 0xd63   :  { %v1855_v15 = vmul.f32 %v4585_v20, %v1847_v27 }
 0xd65   :  { %v1862_v13 = vmul.f32 %v3733_v26, %v1855_v15 }
 0xd67   :  { %v5692_v19 = vadd.f32 %v1864_v21, %v1862_v13 }
 0xd68   :  { %4597 = dma.done.wait [#allocation4], 2048 }
 0xd69   :  { %4598 = vsyncadd [#allocation4], 4294965248 }
 0xd6a   :  { %4599 = dma.done.wait [#allocation4 + $0x1], 16384 }
 0xd6b   :  { %4600 = vsyncadd [#allocation4 + $0x1], 4294950912  ;;  %2458 = vmatprep.mubr.f32.mxu1 %v6040_v7  ;;  %2529 = vmatprep.mubr.f32.mxu0 %v6040_v7  ;;  %v1876_v14 = vld [vmem:[#allocation2 + $0x8] sm:$0xff]  ;;  %v1878_v30 = vld [vmem:[#allocation2 + $0x18] sm:$0xff]  ;;  %vm3651_vm1 = vcmask 11264  }
 0xd6c   :  { %v1875_v29 = vld [vmem:[#allocation2] sm:$0xff]  ;;  %4257 = vmatprep.subr.bf16.mxu1 %v1876_v14  ;;  %4261 = vmatprep.subr.bf16.mxu0 %v1878_v30  ;;  %v1877_v3 = vld [vmem:[#allocation2 + $0x10] sm:$0xff]  ;;  %v1880_v18 = vld [vmem:[#allocation2 + $0x28] sm:$0xff] }
 0xd6d   :  { %v1882_v2 = vld [vmem:[#allocation2 + $0x38] sm:$0xff]  ;;  %4259 = vmatpush1.bf16.msra.mxu1 %v1875_v29  ;;  %4263 = vmatpush1.bf16.msra.mxu0 %v1877_v3  ;;  %v1879_v23 = vld [vmem:[#allocation2 + $0x20] sm:$0xff]  ;;  %v1881_v26 = vld [vmem:[#allocation2 + $0x30] sm:$0xff] }
 0xd6e   :  { %4265 = vmatprep.subr.bf16.mxu1 %v1880_v18  ;;  %4269 = vmatprep.subr.bf16.mxu0 %v1882_v2  ;;  %v1884_v28 = vld [vmem:[#allocation2 + $0x48] sm:$0xff]  ;;  %v1886_v11 = vld [vmem:[#allocation2 + $0x58] sm:$0xff]  ;;  %v1883_v27 = vld [vmem:[#allocation2 + $0x40] sm:$0xff] }
 0xd6f   :  { %v1885_v6 = vld [vmem:[#allocation2 + $0x50] sm:$0xff]  ;;  %v1888_v31 = vld [vmem:[#allocation2 + $0x68] sm:$0xff]  ;;  %v1890_v5 = vld [vmem:[#allocation2 + $0x78] sm:$0xff]  ;;  %4587 = vrot.lane.b32.xlu1 %v5660_v22, %s4610_s0 }
 0xd70   :  { %3734 = vmatmul.mubr.msk.f32.vlgmr.msra.gmra.mrb[18].mxu1 %vm742_vm8, %v5692_v19  ;;  %3735 = vmatmul.mubr.msk.f32.vlgmr.msra.gmra.mrb[12].mxu0 %vm742_vm8, %v5692_v19  ;;  %v1887_v12 = vld [vmem:[#allocation2 + $0x60] sm:$0xff]  ;;  %v1889_v4 = vld [vmem:[#allocation2 + $0x70] sm:$0xff] }
 0xd71   :  { %4267 = vmatpush1.bf16.msra.mxu1 %v1879_v23  ;;  %4271 = vmatpush1.bf16.msra.mxu0 %v1881_v26 }
 0xd72   :  { %2600 = vmatprep.mubr.f32.mxu1 %v6040_v7  ;;  %2671 = vmatprep.mubr.f32.mxu0 %v6040_v7 }
 0xd73   :  { %4273 = vmatprep.subr.bf16.mxu1 %v1884_v28  ;;  %4277 = vmatprep.subr.bf16.mxu0 %v1886_v11 }
 0xd74   :  { %3736 = vmatmul.mubr.msk.f32.vlgmr.msra.gmra.mrb[20].mxu1 %vm742_vm8, %v5692_v19  ;;  %3737 = vmatmul.mubr.msk.f32.vlgmr.msra.gmra.mrb[14].mxu0 %vm742_vm8, %v5692_v19 }
 0xd75   :  { %4275 = vmatpush1.bf16.msra.mxu1 %v1883_v27  ;;  %4279 = vmatpush1.bf16.msra.mxu0 %v1885_v6  ;;  %v6041_v6 = vld [vmem:[#allocation26_spill] sm:$0xff] }
 0xd76   :  { %2742 = vmatprep.mubr.f32.mxu1 %v6040_v7  ;;  %2813 = vmatprep.mubr.f32.mxu0 %v6040_v7 }
 0xd77   :  { %4281 = vmatprep.subr.bf16.mxu1 %v1888_v31  ;;  %4285 = vmatprep.subr.bf16.mxu0 %v1890_v5 }
 0xd78   :  { %3738 = vmatmul.mubr.msk.f32.vlgmr.msra.gmra.mrb[22].mxu1 %vm742_vm8, %v5692_v19  ;;  %3739 = vmatmul.mubr.msk.f32.vlgmr.msra.gmra.mrb[16].mxu0 %vm742_vm8, %v5692_v19 }
 0xd79   :  { %4283 = vmatpush1.bf16.msra.mxu1 %v1887_v12  ;;  %4287 = vmatpush1.bf16.msra.mxu0 %v1889_v4 }
 0xd7a   :  { %2884 = vmatprep.mubr.f32.mxu1 %v6040_v7  ;;  %2955 = vmatprep.mubr.f32.mxu0 %v6040_v7 }
 0xd7b   :  { %4289 = vmatprep.subr.bf16.mxu1 %v4801_v40  ;;  %4321 = vmatprep.subr.bf16.mxu0 %v4881_v56  ;;  %v5785_v56 = vld [vmem:[%s5946_s5 + $0x8] sm:$0xff] }
 0xd7c   :  { %3740 = vmatmul.mubr.msk.f32.vlgmr.msra.gmra.mrb[24].mxu1 %vm742_vm8, %v5692_v19  ;;  %3741 = vmatmul.mubr.msk.f32.vlgmr.msra.gmra.mrb[18].mxu0 %vm742_vm8, %v5692_v19 }
 0xd7d   :  { %4291 = vmatpush3.bf16.msra.mxu1 %v4761_v32  ;;  %4323 = vmatpush3.bf16.msra.mxu0 %v4841_v48  ;;  %v5755_v32 = vld [vmem:[%s5946_s5 + $0x11] ss:$0 sm:$0xff] }
 0xd7e   :  { %4293 = vmatprep.subr.bf16.mxu1 %v4806_v41  ;;  %4325 = vmatprep.subr.bf16.mxu0 %v4886_v57 }
 0xd7f   :  { %2984 = vrot.lane.b32.xlu0 %v5755_v32, %s4611_s1  ;;  %3561 = vrot.lane.b32.xlu1 %v5755_v32, %s4612_s18 }
 0xd81   :  { %4295 = vmatpush3.bf16.msra.mxu1 %v4766_v33  ;;  %4327 = vmatpush3.bf16.msra.mxu0 %v4846_v49  ;;  %v2311_v33 = vlaneseq }
 0xd82   :  { %4297 = vmatprep.subr.bf16.mxu1 %v4811_v42  ;;  %4329 = vmatprep.subr.bf16.mxu0 %v4891_v58 }
 0xd85   :  { %4299 = vmatpush3.bf16.msra.mxu1 %v4771_v34  ;;  %4331 = vmatpush3.bf16.msra.mxu0 %v4851_v50  ;;  %v5759_v34 = vshrl.u32 %v2311_v33, 7 }
 0xd86   :  { %4301 = vmatprep.subr.bf16.mxu1 %v4816_v43  ;;  %4333 = vmatprep.subr.bf16.mxu0 %v4896_v59 }
 0xd87   :  { %v2329_v15 = vsub.s32 4, %v5759_v34  ;;  %v2337_v14 = vsub.s32 6, %v5759_v34 }
 0xd89   :  { %4303 = vmatpush3.bf16.msra.mxu1 %v4776_v35  ;;  %4335 = vmatpush3.bf16.msra.mxu0 %v4856_v51  ;;  %v2313_v35 = vsub.s32 0, %v5759_v34  ;;  %v2362_v2 = vrot.slane %v5785_v56, %v2329_v15 }
 0xd8a   :  { %4305 = vmatprep.subr.bf16.mxu1 %v4821_v44  ;;  %4337 = vmatprep.subr.bf16.mxu0 %v4901_v60  ;;  %v2333_v44 = vsub.s32 5, %v5759_v34 }
 0xd8d   :  { %4307 = vmatpush3.bf16.msra.mxu1 %v4781_v36  ;;  %4339 = vmatpush3.bf16.msra.mxu0 %v4861_v52  ;;  %v2321_v36 = vsub.s32 2, %v5759_v34 }
 0xd8e   :  { %4309 = vmatprep.subr.bf16.mxu1 %v4826_v45  ;;  %4341 = vmatprep.subr.bf16.mxu0 %v4906_v61  ;;  %v2341_v45 = vsub.s32 7, %v5759_v34 }
 0xd8f   :  { %v2354_v20 = vrot.slane %v5785_v56, %v2321_v36 }
 0xd90   :  { %v2374_v27 = vrot.slane %v5785_v56, %v2341_v45 }
 0xd91   :  { %4311 = vmatpush3.bf16.msra.mxu1 %v4786_v37  ;;  %4343 = vmatpush3.bf16.msra.mxu0 %v4866_v53  ;;  %v5766_v37 = vld [vmem:[%s5946_s5] sm:$0xff]  ;;  %s4616_s5 = smov 48  }
 0xd92   :  { %4313 = vmatprep.subr.bf16.mxu1 %v4831_v46  ;;  %4345 = vmatprep.subr.bf16.mxu0 %v4911_v62  ;;  %v2314_v40 = vrot.slane %v5766_v37, %v2313_v35  ;;  %v2322_v41 = vrot.slane %v5766_v37, %v2321_v36  ;;  %v6042_v36 = vld [vmem:[#allocation9_spill] sm:$0xff] }
 0xd95   :  { %4315 = vmatpush3.bf16.msra.mxu1 %v4791_v38  ;;  %4347 = vmatpush3.bf16.msra.mxu0 %v4871_v54  ;;  %v2317_v38 = vsub.s32 1, %v5759_v34  ;;  %v2334_v54 = vrot.slane %v5766_v37, %v2333_v44 }
 0xd96   :  { %4317 = vmatprep.subr.bf16.mxu1 %v4836_v47  ;;  %4349 = vmatprep.subr.bf16.mxu0 %v4916_v63 }
 0xd97   :  { %v2318_v42 = vrot.slane %v5766_v37, %v2317_v38 }
 0xd99   :  { %4319 = vmatpush3.bf16.msra.mxu1 %v4796_v39  ;;  %4351 = vmatpush3.bf16.msra.mxu0 %v4876_v55  ;;  %v2325_v39 = vsub.s32 3, %v5759_v34  ;;  %v2342_v55 = vrot.slane %v5766_v37, %v2341_v45  ;;  %v6051_v45 = vld [vmem:[#allocation22_spill] sm:$0xff]  ;;  %v6063_v34 = vld [vmem:[#allocation25_spill] sm:$0xff] }
 0xd9a   :  { %4353 = vmatprep.subr.bf16.mxu1 %v4961_v8  ;;  %4385 = vmatprep.subr.bf16.mxu0 %v5041_v24  ;;  %v2346_v24 = vrot.slane %v5785_v56, %v2313_v35 }
 0xd9b   :  { %v2326_v43 = vrot.slane %v5766_v37, %v2325_v39 }
 0xe43   :  { %v2460_v46 = vpop.f32.mrb[18].mxu1  ;;  %v2531_v47 = vpop.f32.mrb[12].mxu0 }
 0xe44   :  { %v2461_v48 = vadd.f32 %v2460_v46, %v2314_v40  ;;  %v2532_v49 = vadd.f32 %v2531_v47, %v2322_v41  ;;  %v2462_v50 = vpop.f32.mrb[19].mxu1  ;;  %v2533_v51 = vpop.f32.mrb[13].mxu0  ;;  %v6045_v40 = vld [vmem:[#allocation27_spill] sm:$0xff]  ;;  %v6047_v41 = vld [vmem:[#allocation21_spill] sm:$0xff] }
 0xe45   :  { %v2463_v52 = vadd.f32 %v2462_v50, %v2318_v42  ;;  %v2534_v53 = vadd.f32 %v2533_v51, %v2326_v43  ;;  %v6048_v42 = vld [vmem:[#allocation16_spill] sm:$0xff]  ;;  %v6052_v46 = vld [vmem:[#allocation17_spill] sm:$0xff]  ;;  %v6055_v51 = vld [vmem:[#allocation23_spill] sm:$0xff] }
 0xe46   :  { %v2964_v57 = vmax.f32 %v2532_v49, 0.0  ;;  %v2962_v62 = vmax.f32 %v2461_v48, 0.0  ;;  %v6049_v43 = vld [vmem:[#allocation28_spill] sm:$0xff]  ;;  %v6053_v47 = vld [vmem:[#allocation29_spill] sm:$0xff]  ;;  %v2330_v48 = vrot.slane %v5766_v37, %v2329_v15  ;;  %v2338_v49 = vrot.slane %v5766_v37, %v2337_v14  ;;  %v6062_v15 = vld [vmem:[#allocation14_spill] sm:$0xff] }
 0xe47   :  { %v2963_v58 = vmax.f32 %v2463_v52, 0.0  ;;  %v2965_v59 = vmax.f32 %v2534_v53, 0.0  ;;  %v5787_v60 = vpop.f32.mrb[20].mxu1  ;;  %v5789_v61 = vpop.f32.mrb[14].mxu0  ;;  %v6054_v50 = vld [vmem:[#allocation12_spill] sm:$0xff]  ;;  %v6056_v52 = vld [vmem:[#allocation18_spill] sm:$0xff] }
 0xe48   :  { %v2604_v63 = vpop.f32.mrb[21].mxu1  ;;  %v2675_v8 = vpop.f32.mrb[15].mxu0  ;;  %v6057_v53 = vld [vmem:[#allocation30_spill] sm:$0xff]  ;;  %v2674_v37 = vadd.f32 %v5789_v61, %v2338_v49  ;;  %v6095_v49 = vld [vmem:[#allocation55_spill] sm:$0xff] }
 0xe49   :  { %3051 = vmatprep.mubr.f32.mxu1 %v2963_v58  ;;  %3121 = vmatprep.mubr.f32.mxu0 %v2965_v59  ;;  %v2605_v21 = vadd.f32 %v2604_v63, %v2334_v54  ;;  %v2676_v13 = vadd.f32 %v2675_v8, %v2342_v55  ;;  %v2350_v54 = vrot.slane %v5785_v56, %v2317_v38  ;;  %v6058_v58 = vld [vmem:[#allocation13_spill] sm:$0xff]  ;;  %v6059_v59 = vld [vmem:[#allocation24_spill] sm:$0xff]  ;;  %v6061_v63 = vld [vmem:[#allocation31_spill] sm:$0xff] }
 0xe4a   :  { %3052 = vmatmul.mubr.f32.vlgmr.msra.gmra.mrb[26].mxu1 %v2962_v62  ;;  %3122 = vmatmul.mubr.f32.vlgmr.msra.gmra.mrb[20].mxu0 %v2964_v57  ;;  %v2358_v55 = vrot.slane %v5785_v56, %v2325_v39  ;;  %v2603_v57 = vadd.f32 %v5787_v60, %v2330_v48  ;;  %v6060_v62 = vld [vmem:[#allocation19_spill] sm:$0xff]  ;;  %v2968_v38 = vmax.f32 %v2674_v37, 0.0  ;;  %v6064_v39 = vld [vmem:[#allocation40_spill] sm:$0xff]  ;;  %v6103_v37 = vld [vmem:[#allocation81_spill] sm:$0xff] }
 0xe4b   :  { %4355 = vmatpush3.bf16.msra.mxu1 %v4921_v0  ;;  %4387 = vmatpush3.bf16.msra.mxu0 %v5001_v16  ;;  %v2967_v30 = vmax.f32 %v2605_v21, 0.0  ;;  %v2969_v29 = vmax.f32 %v2676_v13, 0.0  ;;  %v2744_v3 = vpop.f32.mrb[22].mxu1  ;;  %v2815_v18 = vpop.f32.mrb[16].mxu0  ;;  %v2370_v0 = vrot.slane %v5785_v56, %v2337_v14  ;;  %v2366_v16 = vrot.slane %v5785_v56, %v2333_v44  ;;  %v6050_v44 = vld [vmem:[#allocation11_spill] sm:$0xff]  ;;  %v6065_v56 = vld [vmem:[#allocation56_spill] sm:$0xff] }
 0xe4c   :  { %4357 = vmatprep.subr.bf16.mxu1 %v4966_v9  ;;  %4389 = vmatprep.subr.bf16.mxu0 %v5046_v25  ;;  %v5800_v23 = vadd.f32 %v2744_v3, %v2346_v24  ;;  %v5802_v26 = vadd.f32 %v2815_v18, %v2354_v20  ;;  %v2746_v28 = vpop.f32.mrb[23].mxu1  ;;  %v2817_v11 = vpop.f32.mrb[17].mxu0  ;;  %v2966_v20 = vmax.f32 %v2603_v57, 0.0  ;;  %v6066_v21 = vld [vmem:[#allocation32_spill] sm:$0xff]  ;;  %v6068_v14 = vld [vmem:[#allocation41_spill] sm:$0xff]  ;;  %v6072_v18 = vld [vmem:[#allocation42_spill] sm:$0xff] }
 0xe4d   :  { %3191 = vmatprep.mubr.f32.mxu1 %v2967_v30  ;;  %3261 = vmatprep.mubr.f32.mxu0 %v2969_v29  ;;  %v2747_v8 = vadd.f32 %v2746_v28, %v2350_v54  ;;  %v2818_v24 = vadd.f32 %v2817_v11, %v2358_v55  ;;  %v6067_v13 = vld [vmem:[#allocation48_spill] sm:$0xff]  ;;  %v6069_v30 = vld [vmem:[#allocation57_spill] sm:$0xff]  ;;  %v6074_v28 = vld [vmem:[#allocation34_spill] sm:$0xff] }
 0xe4e   :  { %v6070_v29 = vld [vmem:[#allocation33_spill] sm:$0xff]  ;;  %v6075_v11 = vld [vmem:[#allocation50_spill] sm:$0xff]  ;;  %v6094_v48 = vld [vmem:[#allocation39_spill] sm:$0xff] }
 0xe4f   :  { %4359 = vmatpush3.bf16.msra.mxu1 %v4926_v1  ;;  %4391 = vmatpush3.bf16.msra.mxu0 %v5006_v17  ;;  %v2886_v9 = vpop.f32.mrb[24].mxu1  ;;  %v2957_v25 = vpop.f32.mrb[18].mxu0  ;;  %v6043_v1 = vld [vmem:[#allocation20_spill] sm:$0xff]  ;;  %v6044_v17 = vld [vmem:[#allocation15_spill] sm:$0xff]  ;;  %v2971_v60 = vmax.f32 %v2747_v8, 0.0  ;;  %v2973_v61 = vmax.f32 %v2818_v24, 0.0 }
 0xe50   :  { %4361 = vmatprep.subr.bf16.mxu1 %v4971_v10  ;;  %4393 = vmatprep.subr.bf16.mxu0 %v6041_v6  ;;  %v5811_v31 = vadd.f32 %v2886_v9, %v2362_v2  ;;  %v2888_v5 = vpop.f32.mrb[25].mxu1  ;;  %v5813_v12 = vadd.f32 %v2957_v25, %v2370_v0  ;;  %v2959_v4 = vpop.f32.mrb[19].mxu0  ;;  %v6046_v10 = vld [vmem:[#allocation10_spill] sm:$0xff]  ;;  %v6071_v3 = vld [vmem:[#allocation49_spill] sm:$0xff]  ;;  %v6076_v0 = vld [vmem:[#allocation43_spill] sm:$0xff] }
 0xe51   :  { %v5815_v33 = vadd.f32 %v2888_v5, %v2366_v16  ;;  %v5817_v35 = vadd.f32 %v2959_v4, %v2374_v27  ;;  %v6073_v2 = vld [vmem:[#allocation58_spill] sm:$0xff]  ;;  %v6077_v16 = vld [vmem:[#allocation59_spill] sm:$0xff]  ;;  %v6080_v25 = vld [vmem:[#allocation44_spill] sm:$0xff] }
 0xe52   :  { %v6078_v27 = vld [vmem:[#allocation35_spill] sm:$0xff]  ;;  %v6081_v6 = vld [vmem:[#allocation60_spill] sm:$0xff]  ;;  %v6102_v57 = vld [vmem:[#allocation65_spill] sm:$0xff] }
 0xe53   :  { %4363 = vmatpush3.bf16.msra.mxu1 %v6042_v36  ;;  %4395 = vmatpush3.bf16.msra.mxu0 %v6043_v1  ;;  %v6079_v9 = vld [vmem:[#allocation51_spill] sm:$0xff]  ;;  %v6082_v5 = vld [vmem:[#allocation36_spill] sm:$0xff]  ;;  %v6084_v36 = vld [vmem:[#allocation45_spill] sm:$0xff] }
 0xe54   :  { %4365 = vmatprep.subr.bf16.mxu1 %v6044_v17  ;;  %4397 = vmatprep.subr.bf16.mxu0 %v6045_v40  ;;  %v6083_v4 = vld [vmem:[#allocation52_spill] sm:$0xff]  ;;  %v6085_v1 = vld [vmem:[#allocation61_spill] sm:$0xff]  ;;  %v6110_v8 = vld [vmem:[#allocation67_spill] sm:$0xff] }
 0xe55   :  { %v6086_v17 = vld [vmem:[#allocation37_spill] sm:$0xff]  ;;  %v6098_v54 = vld [vmem:[#allocation64_spill] sm:$0xff]  ;;  %v6111_v24 = vld [vmem:[#allocation83_spill] sm:$0xff] }
 0xe56   :  { %v6087_v40 = vld [vmem:[#allocation53_spill] sm:$0xff]  ;;  %v6099_v55 = vld [vmem:[#allocation80_spill] sm:$0xff] }
 0xe57   :  { %4367 = vmatpush3.bf16.msra.mxu1 %v6046_v10  ;;  %4399 = vmatpush3.bf16.msra.mxu0 %v6047_v41  ;;  %v6088_v10 = vld [vmem:[#allocation46_spill] sm:$0xff] }
 0xe58   :  { %4369 = vmatprep.subr.bf16.mxu1 %v6048_v42  ;;  %4401 = vmatprep.subr.bf16.mxu0 %v6049_v43  ;;  %v6089_v41 = vld [vmem:[#allocation62_spill] sm:$0xff] }
 0xe59   :  { %v6090_v42 = vld [vmem:[#allocation38_spill] sm:$0xff] }
 0xe5a   :  { %v6091_v43 = vld [vmem:[#allocation54_spill] sm:$0xff] }
 0xe5b   :  { %4371 = vmatpush3.bf16.msra.mxu1 %v6050_v44  ;;  %4403 = vmatpush3.bf16.msra.mxu0 %v6051_v45  ;;  %v6092_v44 = vld [vmem:[#allocation47_spill] sm:$0xff] }
 0xe5c   :  { %4373 = vmatprep.subr.bf16.mxu1 %v6052_v46  ;;  %4405 = vmatprep.subr.bf16.mxu0 %v6053_v47  ;;  %v6093_v45 = vld [vmem:[#allocation63_spill] sm:$0xff]  ;;  %v2970_v46 = vmax.f32 %v5800_v23, 0.0  ;;  %v2972_v47 = vmax.f32 %v5802_v26, 0.0  ;;  %v6100_v23 = vld [vmem:[#allocation73_spill] sm:$0xff] }
 0xe5d   :  { %v6101_v26 = vld [vmem:[#allocation89_spill] sm:$0xff] }
 0xe5f   :  { %4375 = vmatpush3.bf16.msra.mxu1 %v6054_v50  ;;  %4407 = vmatpush3.bf16.msra.mxu0 %v6055_v51  ;;  %v6096_v50 = vld [vmem:[#allocation72_spill] sm:$0xff] }
 0xe60   :  { %4377 = vmatprep.subr.bf16.mxu1 %v6056_v52  ;;  %4409 = vmatprep.subr.bf16.mxu0 %v6057_v53  ;;  %v6097_v51 = vld [vmem:[#allocation88_spill] sm:$0xff]  ;;  %v2975_v52 = vmax.f32 %v5815_v33, 0.0  ;;  %v2977_v53 = vmax.f32 %v5817_v35, 0.0  ;;  %v6105_v33 = vld [vmem:[#allocation90_spill] sm:$0xff] }
 0xe61   :  { %v6106_v35 = vld [vmem:[#allocation66_spill] sm:$0xff] }
 0xe63   :  { %4379 = vmatpush3.bf16.msra.mxu1 %v6058_v58  ;;  %4411 = vmatpush3.bf16.msra.mxu0 %v6059_v59  ;;  %v6104_v58 = vld [vmem:[#allocation74_spill] sm:$0xff] }
 0xe64   :  { %4381 = vmatprep.subr.bf16.mxu1 %v6060_v62  ;;  %4413 = vmatprep.subr.bf16.mxu0 %v6061_v63  ;;  %v6107_v59 = vld [vmem:[#allocation82_spill] sm:$0xff]  ;;  %v6108_v62 = vld [vmem:[#allocation75_spill] sm:$0xff] }
 0xe65   :  { %v6109_v63 = vld [vmem:[#allocation91_spill] sm:$0xff] }
 0xe67   :  { %4383 = vmatpush3.bf16.msra.mxu1 %v6062_v15  ;;  %4415 = vmatpush3.bf16.msra.mxu0 %v6063_v34  ;;  %v6114_v15 = vld [vmem:[#allocation68_spill] sm:$0xff] }
 0xe68   :  { %4417 = vmatprep.subr.bf16.mxu1 %v6064_v39  ;;  %4449 = vmatprep.subr.bf16.mxu0 %v6065_v56  ;;  %v6115_v34 = vld [vmem:[#allocation84_spill] sm:$0xff]  ;;  %v6116_v39 = vld [vmem:[#allocation77_spill] sm:$0xff] }
 0xe69   :  { %v6117_v56 = vld [vmem:[#allocation93_spill] sm:$0xff] }
 0xe6a   :  { %3192 = vmatmul.mubr.f32.vlgmr.msra.gmra.mrb[28].mxu1 %v2966_v20  ;;  %3262 = vmatmul.mubr.f32.vlgmr.msra.gmra.mrb[22].mxu0 %v2968_v38  ;;  %v6112_v20 = vld [vmem:[#allocation76_spill] sm:$0xff] }
 0xe6b   :  { %4419 = vmatpush3.bf16.msra.mxu1 %v6066_v21  ;;  %4451 = vmatpush3.bf16.msra.mxu0 %v6067_v13  ;;  %v6113_v38 = vld [vmem:[#allocation92_spill] sm:$0xff]  ;;  %v6120_v21 = vld [vmem:[#allocation78_spill] sm:$0xff] }
 0xe6c   :  { %4421 = vmatprep.subr.bf16.mxu1 %v6068_v14  ;;  %4453 = vmatprep.subr.bf16.mxu0 %v6069_v30  ;;  %v6121_v13 = vld [vmem:[#allocation94_spill] sm:$0xff] }
 0xe6d   :  { %3331 = vmatprep.mubr.f32.mxu1 %v2971_v60  ;;  %3401 = vmatprep.mubr.f32.mxu0 %v2973_v61  ;;  %v6118_v60 = vld [vmem:[#allocation69_spill] sm:$0xff]  ;;  %v6122_v14 = vld [vmem:[#allocation70_spill] sm:$0xff] }
 0xe6e   :  { %v6119_v61 = vld [vmem:[#allocation85_spill] sm:$0xff]  ;;  %v6123_v30 = vld [vmem:[#allocation86_spill] sm:$0xff] }
 0xe6f   :  { %4423 = vmatpush3.bf16.msra.mxu1 %v6070_v29  ;;  %4455 = vmatpush3.bf16.msra.mxu0 %v6071_v3  ;;  %v6124_v29 = vld [vmem:[#allocation79_spill] sm:$0xff] }
 0xe70   :  { %4425 = vmatprep.subr.bf16.mxu1 %v6072_v18  ;;  %4457 = vmatprep.subr.bf16.mxu0 %v6073_v2  ;;  %v6125_v3 = vld [vmem:[#allocation95_spill] sm:$0xff]  ;;  %v2976_v18 = vmax.f32 %v5813_v12, 0.0  ;;  %v2985_v12 = vpop.permute.xlu0 %2984 }
 0xe71   :  { %v6126_v2 = vld [vmem:[#allocation71_spill] sm:$0xff] }
 0xe73   :  { %4427 = vmatpush3.bf16.msra.mxu1 %v6074_v28  ;;  %4459 = vmatpush3.bf16.msra.mxu0 %v6075_v11  ;;  %v6127_v28 = vld [vmem:[#allocation87_spill] sm:$0xff]  ;;  %v2974_v11 = vmax.f32 %v5811_v31, 0.0 }
 0xe74   :  { %4429 = vmatprep.subr.bf16.mxu1 %v6076_v0  ;;  %4461 = vmatprep.subr.bf16.mxu0 %v6077_v16  ;;  %v6128_v0 = vmov 0.0|0.0  }
 0xe77   :  { %4431 = vmatpush3.bf16.msra.mxu1 %v6078_v27  ;;  %4463 = vmatpush3.bf16.msra.mxu0 %v6079_v9 }
 0xe78   :  { %4433 = vmatprep.subr.bf16.mxu1 %v6080_v25  ;;  %4465 = vmatprep.subr.bf16.mxu0 %v6081_v6 }
 0xe7b   :  { %4435 = vmatpush3.bf16.msra.mxu1 %v6082_v5  ;;  %4467 = vmatpush3.bf16.msra.mxu0 %v6083_v4 }
 0xe7c   :  { %4437 = vmatprep.subr.bf16.mxu1 %v6084_v36  ;;  %4469 = vmatprep.subr.bf16.mxu0 %v6085_v1 }
 0xe7f   :  { %4439 = vmatpush3.bf16.msra.mxu1 %v6086_v17  ;;  %4471 = vmatpush3.bf16.msra.mxu0 %v6087_v40 }
 0xe80   :  { %4441 = vmatprep.subr.bf16.mxu1 %v6088_v10  ;;  %4473 = vmatprep.subr.bf16.mxu0 %v6089_v41 }
 0xe83   :  { %4443 = vmatpush3.bf16.msra.mxu1 %v6090_v42  ;;  %4475 = vmatpush3.bf16.msra.mxu0 %v6091_v43 }
 0xe84   :  { %4445 = vmatprep.subr.bf16.mxu1 %v6092_v44  ;;  %4477 = vmatprep.subr.bf16.mxu0 %v6093_v45 }
 0xe87   :  { %4447 = vmatpush3.bf16.msra.mxu1 %v6094_v48  ;;  %4479 = vmatpush3.bf16.msra.mxu0 %v6095_v49 }
 0xe88   :  { %4481 = vmatprep.subr.bf16.mxu1 %v6096_v50  ;;  %4513 = vmatprep.subr.bf16.mxu0 %v6097_v51 }
 0xe8a   :  { %3332 = vmatmul.mubr.f32.vlgmr.msra.gmra.mrb[30].mxu1 %v2970_v46  ;;  %3402 = vmatmul.mubr.f32.vlgmr.msra.gmra.mrb[24].mxu0 %v2972_v47 }
 0xe8b   :  { %4483 = vmatpush3.bf16.msra.mxu1 %v6098_v54  ;;  %4515 = vmatpush3.bf16.msra.mxu0 %v6099_v55 }
 0xe8c   :  { %4485 = vmatprep.subr.bf16.mxu1 %v6100_v23  ;;  %4517 = vmatprep.subr.bf16.mxu0 %v6101_v26 }
 0xe8d   :  { %3471 = vmatprep.mubr.f32.mxu1 %v2975_v52  ;;  %3541 = vmatprep.mubr.f32.mxu0 %v2977_v53 }
 0xe8f   :  { %4487 = vmatpush3.bf16.msra.mxu1 %v6102_v57  ;;  %4519 = vmatpush3.bf16.msra.mxu0 %v6103_v37 }
 0xe90   :  { %4489 = vmatprep.subr.bf16.mxu1 %v6104_v58  ;;  %4521 = vmatprep.subr.bf16.mxu0 %v6105_v33  ;;  %v4588_v58 = vpop.permute.xlu1 %4587 }
 0xe91   :  { %v4590_v33 = vunpack.i.h.bf16 %v4588_v58 }
 0xe93   :  { %4491 = vmatpush3.bf16.msra.mxu1 %v6106_v35  ;;  %4523 = vmatpush3.bf16.msra.mxu0 %v6107_v59  ;;  %v4589_v35 = vunpack.i.l.bf16 %v4588_v58 }
 0xe94   :  { %4493 = vmatprep.subr.bf16.mxu1 %v6108_v62  ;;  %4525 = vmatprep.subr.bf16.mxu0 %v6109_v63 }
 0xe95   :  { %v4545_v59 = vpack.c.bf16 %v4590_v33, %v4589_v35 }
 0xe97   :  { %4495 = vmatpush3.bf16.msra.mxu1 %v6110_v8  ;;  %4527 = vmatpush3.bf16.msra.mxu0 %v6111_v24 }
 0xe98   :  { %4497 = vmatprep.subr.bf16.mxu1 %v6112_v20  ;;  %4529 = vmatprep.subr.bf16.mxu0 %v6113_v38 }
 0xe9b   :  { %4499 = vmatpush3.bf16.msra.mxu1 %v6114_v15  ;;  %4531 = vmatpush3.bf16.msra.mxu0 %v6115_v34 }
 0xe9c   :  { %4501 = vmatprep.subr.bf16.mxu1 %v6116_v39  ;;  %4533 = vmatprep.subr.bf16.mxu0 %v6117_v56 }
 0xe9f   :  { %4503 = vmatpush3.bf16.msra.mxu1 %v6118_v60  ;;  %4535 = vmatpush3.bf16.msra.mxu0 %v6119_v61 }
 0xea0   :  { %4505 = vmatprep.subr.bf16.mxu1 %v6120_v21  ;;  %4537 = vmatprep.subr.bf16.mxu0 %v6121_v13 }
 0xea3   :  { %4507 = vmatpush3.bf16.msra.mxu1 %v6122_v14  ;;  %4539 = vmatpush3.bf16.msra.mxu0 %v6123_v30 }
 0xea4   :  { %4509 = vmatprep.subr.bf16.mxu1 %v6124_v29  ;;  %4541 = vmatprep.subr.bf16.mxu0 %v6125_v3 }
 0xea7   :  { %4511 = vmatpush3.bf16.msra.mxu1 %v6126_v2  ;;  %4543 = vmatpush3.bf16.msra.mxu0 %v6127_v28 }
 0xea8   :  { %4544 = vmatprep.subr.bf16.mxu1 %v6128_v0 }
 0xeaa   :  { %3472 = vmatmul.mubr.f32.vlgmr.msra.gmra.mrb[32].mxu1 %v2974_v11  ;;  %3542 = vmatmul.mubr.f32.vlgmr.msra.gmra.mrb[26].mxu0 %v2976_v18 }
 0xeab   :  { %4205 = vmatprep.mubr.msk.f32.mxu1 %vm4608_vm11, %v6040_v7  ;;  %4546 = vmatpush3.bf16.msra.mxu1 %v4545_v59 }
 0xf1d   :  { %v3833_v16 = vpop.f32.mrb[26].mxu1  ;;  %v3868_v27 = vpop.f32.mrb[20].mxu0 }
 0xf1e   :  { %v3834_v9 = vpop.f32.mrb[27].mxu1  ;;  %v3869_v25 = vpop.f32.mrb[21].mxu0 }
 0xf1f   :  { %v3835_v6 = vadd.f32 %v3834_v9, %v3833_v16  ;;  %v3870_v31 = vadd.f32 %v3869_v25, %v3868_v27 }
 0xf21   :  { %v3054_v5 = vadd.f32 %v3835_v6, %v2985_v12 }
 0xf23   :  { %v3124_v4 = vadd.f32 %v3870_v31, %v3054_v5 }
 0xf3d   :  { %v3903_v36 = vpop.f32.mrb[28].mxu1  ;;  %v3938_v1 = vpop.f32.mrb[22].mxu0 }
 0xf3e   :  { %v3904_v17 = vpop.f32.mrb[29].mxu1  ;;  %v3939_v40 = vpop.f32.mrb[23].mxu0 }
 0xf3f   :  { %v3905_v7 = vadd.f32 %v3904_v17, %v3903_v36  ;;  %v3940_v10 = vadd.f32 %v3939_v40, %v3938_v1 }
 0xf41   :  { %v3194_v41 = vadd.f32 %v3905_v7, %v3124_v4 }
 0xf43   :  { %v3264_v22 = vadd.f32 %v3940_v10, %v3194_v41 }
 0xf5d   :  { %v3973_v42 = vpop.f32.mrb[30].mxu1  ;;  %v4008_v43 = vpop.f32.mrb[24].mxu0 }
 0xf5e   :  { %v3974_v44 = vpop.f32.mrb[31].mxu1  ;;  %v4009_v45 = vpop.f32.mrb[25].mxu0 }
 0xf5f   :  { %v3975_v46 = vadd.f32 %v3974_v44, %v3973_v42  ;;  %v4010_v47 = vadd.f32 %v4009_v45, %v4008_v43 }
 0xf61   :  { %v3334_v48 = vadd.f32 %v3975_v46, %v3264_v22 }
 0xf63   :  { %v3404_v49 = vadd.f32 %v4010_v47, %v3334_v48 }
 0xf7d   :  { %v4043_v50 = vpop.f32.mrb[32].mxu1  ;;  %v4078_v51 = vpop.f32.mrb[26].mxu0 }
 0xf7e   :  { %v4044_v52 = vpop.f32.mrb[33].mxu1  ;;  %v4079_v53 = vpop.f32.mrb[27].mxu0 }
 0xf7f   :  { %v4045_v54 = vadd.f32 %v4044_v52, %v4043_v50  ;;  %v4080_v55 = vadd.f32 %v4079_v53, %v4078_v51 }
 0xf81   :  { %v3474_v23 = vadd.f32 %v4045_v54, %v3404_v49 }
 0xf83   :  { %v3544_v26 = vadd.f32 %v4080_v55, %v3474_v23 }
 0xf85   :  { %v3547_v57 = vadd.f32 %v3544_v26, %v5692_v19  ;;  %v3562_v19 = vpop.permute.xlu1 %3561 }
 0xf87   :  { %v3548_v37 = vsel %vm1841_vm0, %v3547_v57, 0.0 }
 0xf88   :  { %3549 = vadd.xlane.f32.xlu0 %v3548_v37 }
0x1015   :  { %v3550_v62 = vpop.xlane.xlu0 %3549 }
0x1016   :  { %v3551_v63 = vmul.f32 0.0625, %v3550_v62 }
0x1018   :  { %v3552_v8 = vsub.f32 %v3547_v57, %v3551_v63 }
0x101a   :  { %v3553_v24 = vmul.f32 %v3552_v8, %v3552_v8 }
0x101c   :  { %v3554_v20 = vsel %vm1841_vm0, %v3553_v24, 0.0 }
0x101d   :  { %3555 = vadd.xlane.f32.xlu1 %v3554_v20 }
0x102e   :  { %3565 = vrot.lane.b32.xlu1 %v5755_v32, %s4610_s0 }
0x1032   :  { %3575 = vrot.lane.b32.xlu1 %v5755_v32, %s4616_s5 }
0x10aa   :  { %v3556_v38 = vpop.xlane.xlu1 %3555 }
0x10ab   :  { %v3557_v15 = vmul.f32 0.0625, %v3556_v38 }
0x10ad   :  { %v3558_v34 = vadd.f32 1e-05, %v3557_v15 }
0x10ae   :  { %v3566_v60 = vpop.permute.xlu1 %3565 }
0x10af   :  { %4591 = vrsqrt.f32 %v3558_v34 }
0x10b2   :  { %v3576_v13 = vpop.permute.xlu1 %3575 }
0x10b9   :  { %v4592_v39 = vpop.eup %4591 }
0x10ba   :  { %v3560_v56 = vmul.f32 %v4592_v39, %v3552_v8 }
0x10bc   :  { %v3564_v61 = vmul.f32 %v3562_v19, %v3560_v56 }
0x10be   :  { %v3568_v21 = vadd.f32 %v3566_v60, %v3564_v61 }
0x10c0   :  { %4206 = vmatmul.mubr.msk.f32.vlgmr.msra.gmra.mrb[34].mxu1 %vm742_vm8, %v3568_v21 }
0x1193   :  { %v3647_v14 = vpop.f32.mrb[34].mxu1 }
0x1194   :  { %v3648_v30 = vadd.f32 %v3647_v14, %v3576_v13  ;;  %v4207_v29 = vpop.f32.mrb[35].mxu1 }
0x1196   :  { %v3652_v3 = vsel %vm3651_vm1, %v3648_v30, -inf }
0x1197   :  { %3653 = vmax.xlane.f32.xlu1 %v3652_v3 }
0x1224   :  { %v3654_v32 = vpop.xlane.xlu1 %3653 }
0x1225   :  { %v3655_v18 = vsub.f32 %v3648_v30, %v3654_v32 }
0x1227   :  { %v3656_v2 = vmul.f32 1.442695, %v3655_v18 }
0x1229   :  { %4593 = vpow2.f32 %v3656_v2 }
0x1233   :  { %v4594_v28 = vpop.eup %4593 }
0x1234   :  { %v3658_v11 = vsel %vm3651_vm1, %v4594_v28, 0.0 }
0x1235   :  { %3659 = vadd.xlane.f32.xlu0 %v3658_v11 }
0x12c2   :  { %v3660_v0 = vpop.xlane.xlu0 %3659 }
0x12c3   :  { %4595 = vlog2.f32 %v3660_v0 }
0x12cd   :  { %v4596_v12 = vpop.eup %4595 }
0x12ce   :  { %v3662_v16 = vmul.f32 0.6931472, %v4596_v12 }
0x12d0   :  { %v3663_v27 = vadd.f32 %v3662_v16, %v3654_v32 }
0x12d2   :  { %v3664_v9 = vsub.f32 %v3648_v30, %v3663_v27 }
0x12d4   :  { %3665 = vst.msk [vmem:[%s5949_s8] sm:$0xf] %vm3651_vm1, %v3664_v9 }
0x12d5   :  { %3670 = vsyncmov [#allocation4] }
0x12d8   :  { %s3671_s11 = vpop.sfrf %3670 }
0x12d9   :  { %p3744_p0 = scmp.ne.s32.totalorder %s3671_s11, 0 }
0x12db   :  { %3675 = shalt.err (%p3744_p0)  }
0x12dc   :  { %3677 = vsyncmov [#allocation4 + $0x1] }
0x12df   :  { %s3678_s7 = vpop.sfrf %3677 }
0x12e0   :  { %p3745_p1 = scmp.ne.s32.totalorder %s3678_s7, 0 }
0x12e2   :  { %3682 = shalt.err (%p3745_p1)  }

</bundles_post_ra>
